<compile_context>
chip_gen: v7x
topology: tpu7x:2x2x1
jax: 0.10.0
libtpu: 0.0.40
codegen_flags: <defaults>
</compile_context>

<pallas_src>
import jax
import jax.numpy as jnp
from jax.experimental import pallas as pl
from jax.experimental.pallas import tpu as pltpu


_LANES = 128                          # vreg lane width
_MIN_PALLAS_BYTES = 2 * 1024 * 1024   # below this, XLA's (fusable) multiply wins
_TARGET_TILE_BYTES = 4 * 1024 * 1024  # ~4 MiB per buffer; 2 in + 2 out double
                                      # buffers = 16 MiB < 32 MiB scoped VMEM


def _scale_kernel(w_ref, x_ref, o_ref):
    # weight lives in SMEM -> single executable for all weight values.
    # Multiply in the loss dtype (matches PyTorch `tensor * python_float`).
    o_ref[...] = x_ref[...] * w_ref[0].astype(x_ref.dtype)


def _round_up(a: int, b: int) -> int:
    return -(-a // b) * b


def _scale_by_weight(x: jax.Array, weight: float) -> jax.Array:
    """out = x * weight.  Pallas kernel only for large, tile-friendly floats."""
    x = jnp.asarray(x)
    weight = float(weight)
    is_float = jnp.issubdtype(x.dtype, jnp.floating)

    # ---- identity / zero early-outs (float only: ints must promote like torch)
    if is_float and weight == 1.0:
        return x
    if is_float and weight == 0.0:
        return jnp.zeros_like(x)

    n = x.size
    itemsize = x.dtype.itemsize

    # ---- XLA fast path: int dtypes, small/medium losses, ragged sizes ------
    if (not is_float) or (n * itemsize < _MIN_PALLAS_BYTES) or (n % _LANES != 0):
        return x * weight

    # ---- Pallas path: large, lane-divisible float loss maps ----------------
    rows = n // _LANES                                    # exact (no padding)
    # sub-32-bit dtypes pack along sublanes; keep block rows a multiple so
    # stores stay unmasked full-width vst.
    sublane = 8 if itemsize >= 4 else (16 if itemsize == 2 else 32)

    target_rows = _round_up(
        max(1, _TARGET_TILE_BYTES // (_LANES * itemsize)), sublane)
    # v7x: ensure grid >= 2 so dimension_semantics=("parallel",) can actually
    # split the stream across both TensorCores.
    half_rows = _round_up(pl.cdiv(rows, 2), sublane)
    r_blk = max(sublane, min(target_rows, half_rows))
    grid = (pl.cdiv(rows, r_blk),)                        # partial last block OK

    slab = x.reshape(rows, _LANES)                        # pure reshape, no copy
    w_arr = jnp.asarray(weight, dtype=jnp.float32).reshape(1)

    out = pl.pallas_call(
        _scale_kernel,
        out_shape=jax.ShapeDtypeStruct(slab.shape, x.dtype),
        grid=grid,
        in_specs=[
            pl.BlockSpec(memory_space=pltpu.MemorySpace.SMEM),   # weight scalar
            pl.BlockSpec((r_blk, _LANES), lambda i: (i, 0)),
        ],
        out_specs=pl.BlockSpec((r_blk, _LANES), lambda i: (i, 0)),
        compiler_params=pltpu.CompilerParams(
            dimension_semantics=("parallel",),                   # megacore on v7x
            vmem_limit_bytes=32 * 1024 * 1024,
        ),
    )(w_arr, slab)

    return out.reshape(x.shape)


class LossExtractFromBatchDict:
    """
    Read the loss from batch dict and scale it by `weight`.
    JAX/Pallas equivalent of fuse.dl.losses.loss_extract.LossExtractFromBatchDict.
    """

    def __init__(self, key: str, weight: float = 1.0) -> None:
        self.key = key
        self.weight = weight

    def __call__(self, batch_dict: dict) -> jax.Array:
        # TODO(synk): dict lookup is pure Python glue; only the multiply is a
        # tensor op (Pallas for large float maps, XLA otherwise).
        return _scale_by_weight(batch_dict[self.key], self.weight)


if __name__ == "__main__":
    key = jax.random.PRNGKey(0)
    k1, k2, k3, k4 = jax.random.split(key, 4)

    # Small per-sample vector + scalar loss (XLA fast path).
    per_sample_loss = jax.random.uniform(k1, (8,), dtype=jnp.float32)
    scalar_loss = jnp.float32(0.4242)
    # Large per-pixel loss map: 4 MiB f32 -> Pallas path, grid = 2.
    pixel_loss = jax.random.uniform(k2, (2, 8, 256, 256), dtype=jnp.float32)
    # Same map in bf16 (packed-sublane path), 2 MiB -> Pallas path, grid = 2.
    pixel_loss_bf16 = pixel_loss.astype(jnp.bfloat16)
    # Ragged shape -> routed to XLA (no pad / slice-back copies).
    ragged_loss = jax.random.uniform(k3, (3, 5, 70, 131), dtype=jnp.float32)
    # Integer loss -> XLA with float promotion, like torch int * float.
    int_loss = jnp.arange(2 * 3 * 4, dtype=jnp.int32).reshape(2, 3, 4)

    batch_dict = {
        "model.losses.seg_vec": per_sample_loss,
        "model.losses.cls": scalar_loss,
        "model.losses.seg_map": pixel_loss,
        "model.losses.seg_map_bf16": pixel_loss_bf16,
        "model.losses.ragged": ragged_loss,
        "model.losses.count": int_loss,
    }

    cases = [
        ("model.losses.seg_vec", 0.7, per_sample_loss),
        ("model.losses.cls", 2.5, scalar_loss),
        ("model.losses.seg_map", 0.7, pixel_loss),
        ("model.losses.seg_map", 1.0, pixel_loss),          # identity early-out
        ("model.losses.seg_map_bf16", 0.7, pixel_loss_bf16),
        ("model.losses.ragged", 1.3, ragged_loss),
        ("model.losses.count", 2.5, int_loss),
    ]

    for name, w, ref_in in cases:
        loss_fn = LossExtractFromBatchDict(key=name, weight=w)
        out = jax.block_until_ready(loss_fn(batch_dict))
        ref = jnp.asarray(ref_in) * w
        assert out.shape == jnp.shape(ref_in), (name, out.shape)
        assert out.dtype == ref.dtype, (name, out.dtype, ref.dtype)
        tol = 1e-2 if out.dtype == jnp.bfloat16 else 1e-6
        assert jnp.allclose(out.astype(jnp.float32), ref.astype(jnp.float32),
                            rtol=tol, atol=tol), name

    print("KERNEL_OK")
</pallas_src>

<mosaic_0001>
module attributes {stable_mosaic.version = 11 : i64} {
  func.func @_scale_kernel(%arg0: i32, %arg1: memref<1xf32, #tpu.memory_space<smem>>, %arg2: memref<4096x128xf32, #tpu.memory_space<vmem>>, %arg3: memref<4096x128xf32, #tpu.memory_space<vmem>>) attributes {dimension_semantics = [#tpu.dimension_semantics<parallel>], iteration_bounds = array<i64: 2>, scalar_prefetch = 0 : i64, scratch_operands = 0 : i64, tpu.core_type = #tpu.core_type<tc>, window_params = [{transform_indices = @transform_0, window_bounds = array<i64: 1>}, {transform_indices = @transform_1, window_bounds = array<i64: 4096, 128>}, {transform_indices = @transform_2, window_bounds = array<i64: 4096, 128>}]} {
    %c0 = arith.constant 0 : index
    %c0_0 = arith.constant 0 : index
    %0 = vector.load %arg2[%c0, %c0_0] : memref<4096x128xf32, #tpu.memory_space<vmem>>, vector<4096x128xf32>
    %c0_1 = arith.constant 0 : index
    %1 = memref.load %arg1[%c0_1] : memref<1xf32, #tpu.memory_space<smem>>
    %2 = vector.broadcast %1 : f32 to vector<4096x128xf32>
    %3 = arith.mulf %0, %2 : vector<4096x128xf32>
    %c0_2 = arith.constant 0 : index
    %c0_3 = arith.constant 0 : index
    %4 = vector.load %arg3[%c0_2, %c0_3] : memref<4096x128xf32, #tpu.memory_space<vmem>>, vector<4096x128xf32>
    tpu.vector_store %arg3[%c0_2, %c0_3], %3 {strides = array<i32>} : memref<4096x128xf32, #tpu.memory_space<vmem>>, vector<4096x128xf32>,
    return
  }
  func.func @transform_0(%arg0: i32) -> i32 {
    %c0_i32 = arith.constant 0 : i32
    %c0_i32_0 = arith.constant 0 : i32
    return %c0_i32 : i32
  }
  func.func @transform_1(%arg0: i32) -> (i32, i32) {
    %c0_i32 = arith.constant 0 : i32
    %c0_i32_0 = arith.constant 0 : i32
    return %arg0, %c0_i32 : i32, i32
  }
  func.func @transform_2(%arg0: i32) -> (i32, i32) {
    %c0_i32 = arith.constant 0 : i32
    %c0_i32_0 = arith.constant 0 : i32
    return %arg0, %c0_i32 : i32, i32
  }
}

</mosaic_0001>

<bundles_post_ra>
// kernel: tpu_custom_call.1
= control target key start
LH: loop header
LB: loop body
LE: loop exit
PB: predicated region body
PF: predicated region fallthrough
CT: control target
= control target key end

     0   :  { %s3683_s0 = inlined_call_operand.<no memory space> [shape: f32[1], index: 0, kind: input, shape index: {}]   ;;  %s3684_s1 = inlined_call_operand.hbm [shape: f32[8192,128], index: 1, kind: input, shape index: {}]   ;;  %s3685_s2 = inlined_call_operand.hbm [shape: f32[8192,128], index: 2, kind: output, shape index: {}]  }
   0x1   :  { %7 = sst [smem:[#allocation2]] %s3683_s0 }
   0x2   :  { %8 = vsyncpa [#allocation4], 0 }
   0x3   :  { %10 = vsyncpa [#allocation4 + $0x1], 0 }
   0x4   :  { %11 = vsyncpa [#allocation5], 0 }
   0x5   :  { %13 = vsyncpa [#allocation5 + $0x1], 0  ;;  %s1978_s11 = smov 0   ;;  %s1980_s12 = smov 0  }
   0x6   :  { %s1982_s13 = smov 0   ;;  %s1984_s14 = smov 0  }
   0x7 LB: > { %s1999_s0 = sadd.s32 4294967295, %s1952_s14   ;;  %s1790_s15 = sadd.s32 4294967294, %s1952_s14   ;;  %s1952_s14 = sphi %s1984_s14, %s3698_s14   ;;  %s1948_s13 = sphi %s1982_s13, %s3697_s13   ;;  %s1944_s12 = sphi %s1980_s12, %s3696_s12   ;;  %s1940_s11 = sphi %s1978_s11, %s3695_s11  }
   0x8   : > { %s2003_s16 = sadd.s32 1, %s1952_s14   ;;  %s47_s17 = sadd.s32 1, %s1948_s13 }
   0x9   : > { %s44_s18 = ssub.s32 %s1952_s14, %s2003_s16  ;;  %p54_p0 = scmp.ne.s32.totalorder %s1948_s13, %s1944_s12 }
   0xa   : > { %p45_p1 = scmp.eq.s32.totalorder %s44_s18, 0  ;;  %p55_p2 = scmp.eq.s32.totalorder %s1952_s14, 0 }
   0xb   : > { %p60_p3 = scmp.ne.s32.totalorder %s1944_s12, %s1940_s11  ;;  %p61_p4 = scmp.eq.s32.totalorder %s1999_s0, 0 }
   0xc   : > { %s2015_s19 = scalar_select %p45_p1, %s1948_s13, %s47_s17  }
   0xd   : > { %p2017_p5 = por %p55_p2, %p54_p0  ;;  %p2021_p6 = por %p61_p4, %p60_p3 }
   0xe   : > { %p84_p7 = scmp.eq.s32.totalorder %s1999_s0, 1  ;;  %p90_p8 = scmp.eq.s32.totalorder %s1790_s15, 1 }
   0xf   : > { %p1818_p10 = scmp.lt.s32.totalorder %s1952_s14, 2  ;;  %s113_s24 = sand.u32 1, %s1948_s13  }
  0x10   : > { %p2028_p11 = por %p84_p7, %p54_p0  ;;  %p2032_p12 = por %p90_p8, %p60_p3 }
  0x11   : > { %s1804_s25 = sshll.u32 %s1952_s14, 16  ;;  %s1793_s26 = sshll.u32 %s113_s24, 12 }
  0x12   : > { %s3689_s22 = scalar_select %p2028_p11, 1, 0 }
  0x13   : > { %s3690_s23 = scalar_select %p2032_p12, 1, 0 }
  0x14   : > { %s2041_s29 = scalar_lea.hbm %s3684_s1, %s1804_s25  ;;  %s117_s30 = scalar_lea.vmem [#allocation3], %s1793_s26 }
  0x15   : > { %s124_s3 = sshll.u32 %s117_s30, 4  ;;  %p2045_p13 = pnand %p1818_p10, %p2017_p5  ;;  %s2049_s3 = int_to_ptr.vmem [resolvable:$true] %s124_s3 }
  0x16   : > { %s2051_s5 = scalar_lea.sflag [#allocation4], %s113_s24  ;;  %s1856_s6 = scalar_lea.hbm %s2041_s29, 65536 }
  0x17   : > { %p1857_p0 = scmp.ne.s32.totalorder %s2041_s29, %s1856_s6  ;;  %p1858_p1 = pneg %p2045_p13 }
  0x18   : > { %s1861_s9 = scalar_lea.hbm %s3684_s1, 131072  ;;  %p1862_p4 = scmp.lt.u32.totalorder %s2041_s29, %s3684_s1 }
  0x19   : > { %p1859_p2 = pnand %p1858_p1, %p1857_p0  ;;  %p1863_p5 = scmp.lt.u32.totalorder %s1861_s9, %s1856_s6 }
  0x1a   : > { %p1865_p8 = scmp.lt.u32.totalorder %s1856_s6, %s2041_s29 }
  0x1b   : > { %p1860_p3 = pneg %p1859_p2  ;;  %p1864_p7 = por %p1863_p5, %p1862_p4 }
  0x1d   : > { %p1866_p10 = por %p1865_p8, %p1864_p7 }
  0x1f   : > { %p1867_p9 = pnand %p1866_p10, %p1860_p3 }
  0x21   : > { %1870 = shalt.err (!%p1867_p9)
}
  0x22   : > { %s1871_s17 = scalar_lea.vmem %s2049_s3, 65536  ;;  %s1954_s18 = smov [#allocation3]  }
  0x23   : > { %p1872_p0 = scmp.ne.s32.totalorder %s2049_s3, %s1871_s17  ;;  %s1876_s20 = sshll.u32 %s1954_s18, 4  ;;  %s1877_s20 = int_to_ptr.vmem [resolvable:$false] %s1876_s20 }
  0x24   : > { %s1878_s24 = scalar_lea.vmem %s1877_s20, 131072  ;;  %p1879_p11 = scmp.lt.s32.totalorder %s2049_s3, %s1877_s20 }
  0x25   : > { %p1874_p2 = pnand %p1872_p0, %p1858_p1  ;;  %p1880_p4 = scmp.lt.s32.totalorder %s1878_s24, %s1871_s17 }
  0x27   : > { %p1875_p12 = pneg %p1874_p2  ;;  %p1881_p5 = por %p1880_p4, %p1879_p11 }
  0x29   : > { %p1882_p7 = pnand %p1881_p5, %p1875_p12 }
  0x2b   : > { %1885 = shalt.err (!%p1882_p7)
}
  0x2c   : > { %s1955_s25 = smov 128   ;;  %s1956_s26 = smov 8  }
  0x2d   : > { %1813 = dma.hbm_to_vmem [thread:$0]  (!%p2045_p13), %s2041_s29, 65536, %s2049_s3, %s2051_s5, %s1955_s25, %s1955_s25, %s1956_s26  }
  0x2e   : > { %p1796_p9 = scmp.ge.s32.totalorder %s1952_s14, 1  ;;  %p132_p1 = scmp.lt.s32.totalorder %s1952_s14, 3 }
  0x30   : > { %p133_p3 = pnand %p1796_p9, %p132_p1 }
  0x31   : > { %s2082_s27 = sand.u32 (!%p133_p3), 1, %s1944_s12  }
  0x32   : > { %136 = sbr.rel (%p133_p3) target bundleno = 337 (0x151), region = 28  ;;  %s1797_s28 = sshll.u32 (!%p133_p3), %s2082_s27, 12 }
  0x33   : > { %s139_s30 = scalar_lea.sflag (!%p133_p3), [#allocation4], %s2082_s27  ;;  %s2086_s6 = scalar_lea.vmem (!%p133_p3), [#allocation3], %s1797_s28 }
  0x39   : > { %1931 = dma.done.wait (%p2021_p6), %s139_s30, 65536  }
  0x3a   : > { %1933 = vsyncadd (%p2021_p6), %s139_s30, 4294901760  ;;  %s677_s29 = sld [smem:[#allocation2]]  ;;  %v165_v0 = vld [vmem:[%s2086_s6] sm:$0xff]  ;;  %v166_v2 = vld [vmem:[%s2086_s6 + $0x8] sm:$0xff]  ;;  %s2109_s21 = scalar_lea.vmem [#allocation6], %s1797_s28 }
  0x3b   : > { %v167_v3 = vld [vmem:[%s2086_s6 + $0x10] sm:$0xff]  ;;  %v168_v7 = vld [vmem:[%s2086_s6 + $0x18] sm:$0xff]  ;;  %v169_v8 = vld [vmem:[%s2086_s6 + $0x20] sm:$0xff]  ;;  %s1805_s3 = sshll.u32 %s1999_s0, 16  ;;  %s1717_s4 = sshll.u32 %s2109_s21, 4  ;;  %s3629_s4 = int_to_ptr.vmem [resolvable:$true] %s1717_s4 }
  0x3c   : > { %v170_v9 = vld [vmem:[%s2086_s6 + $0x28] sm:$0xff]  ;;  %v171_v13 = vld [vmem:[%s2086_s6 + $0x30] sm:$0xff]  ;;  %v172_v14 = vld [vmem:[%s2086_s6 + $0x38] sm:$0xff]  ;;  %s3627_s7 = scalar_lea.hbm %s3685_s2, %s1805_s3  ;;  %s1704_s8 = scalar_lea.sflag [#allocation5], %s2082_s27 }
  0x3d   : > { %v173_v15 = vld [vmem:[%s2086_s6 + $0x40] sm:$0xff]  ;;  %v174_v19 = vld [vmem:[%s2086_s6 + $0x48] sm:$0xff]  ;;  %v175_v20 = vld [vmem:[%s2086_s6 + $0x50] sm:$0xff]  ;;  %s1886_s9 = scalar_lea.vmem %s3629_s4, 65536  ;;  %p3692_p11 = scmp.ne.s32.totalorder %s3689_s22, 0 }
  0x3e   : > { %v176_v21 = vld [vmem:[%s2086_s6 + $0x58] sm:$0xff]  ;;  %v177_v25 = vld [vmem:[%s2086_s6 + $0x60] sm:$0xff]  ;;  %v178_v26 = vld [vmem:[%s2086_s6 + $0x68] sm:$0xff]  ;;  %p1887_p6 = scmp.ne.s32.totalorder %s3629_s4, %s1886_s9  ;;  %s1957_s10 = smov [#allocation6]  }
  0x3f   : > { %v179_v27 = vld [vmem:[%s2086_s6 + $0x70] sm:$0xff]  ;;  %v180_v31 = vld [vmem:[%s2086_s6 + $0x78] sm:$0xff]  ;;  %v181_v32 = vld [vmem:[%s2086_s6 + $0x80] sm:$0xff]  ;;  %s1890_s15 = sshll.u32 %s1957_s10, 4  ;;  %s1891_s15 = int_to_ptr.vmem [resolvable:$false] %s1890_s15 }
  0x40   : > { %v2093_v1 = vstv %s677_s29  ;;  %v182_v33 = vld [vmem:[%s2086_s6 + $0x88] sm:$0xff]  ;;  %v183_v37 = vld [vmem:[%s2086_s6 + $0x90] sm:$0xff]  ;;  %v184_v38 = vld [vmem:[%s2086_s6 + $0x98] sm:$0xff]  ;;  %p1888_p12 = pnand %p1887_p6, %p3692_p11  ;;  %s1892_s17 = scalar_lea.vmem %s1891_s15, 131072 }
  0x41   : > { %v679_v4 = vmul.f32 %v2093_v1, %v165_v0  ;;  %v680_v5 = vmul.f32 %v2093_v1, %v166_v2  ;;  %v681_v6 = vmul.f32 %v2093_v1, %v167_v3  ;;  %v682_v10 = vmul.f32 %v2093_v1, %v168_v7  ;;  %v185_v39 = vld [vmem:[%s2086_s6 + $0xa0] sm:$0xff]  ;;  %v186_v43 = vld [vmem:[%s2086_s6 + $0xa8] sm:$0xff]  ;;  %v187_v44 = vld [vmem:[%s2086_s6 + $0xb0] sm:$0xff]  ;;  %p1893_p8 = scmp.lt.s32.totalorder %s3629_s4, %s1891_s15  ;;  %p1894_p10 = scmp.lt.s32.totalorder %s1892_s17, %s1886_s9 }
  0x42   : > { %v683_v11 = vmul.f32 %v2093_v1, %v169_v8  ;;  %v684_v12 = vmul.f32 %v2093_v1, %v170_v9  ;;  %v685_v16 = vmul.f32 %v2093_v1, %v171_v13  ;;  %v686_v17 = vmul.f32 %v2093_v1, %v172_v14  ;;  %v188_v45 = vld [vmem:[%s2086_s6 + $0xb8] sm:$0xff]  ;;  %v189_v49 = vld [vmem:[%s2086_s6 + $0xc0] sm:$0xff]  ;;  %v190_v50 = vld [vmem:[%s2086_s6 + $0xc8] sm:$0xff]  ;;  %p1889_p13 = pneg %p1888_p12 }
  0x43   : > { %1191 = vst [vmem:[%s2109_s21] sm:$0xff] %v679_v4  ;;  %1192 = vst [vmem:[%s2109_s21 + $0x8] sm:$0xff] %v680_v5  ;;  %v687_v18 = vmul.f32 %v2093_v1, %v173_v15  ;;  %v688_v22 = vmul.f32 %v2093_v1, %v174_v19  ;;  %v689_v23 = vmul.f32 %v2093_v1, %v175_v20  ;;  %v191_v51 = vld [vmem:[%s2086_s6 + $0xd0] sm:$0xff]  ;;  %v192_v55 = vld [vmem:[%s2086_s6 + $0xd8] sm:$0xff]  ;;  %p1895_p0 = por %p1894_p10, %p1893_p8 }
  0x44   : > { %1193 = vst [vmem:[%s2109_s21 + $0x10] sm:$0xff] %v681_v6  ;;  %1194 = vst [vmem:[%s2109_s21 + $0x18] sm:$0xff] %v682_v10  ;;  %v690_v24 = vmul.f32 %v2093_v1, %v176_v21  ;;  %v691_v28 = vmul.f32 %v2093_v1, %v177_v25  ;;  %v692_v29 = vmul.f32 %v2093_v1, %v178_v26  ;;  %v193_v56 = vld [vmem:[%s2086_s6 + $0xe0] sm:$0xff]  ;;  %v194_v57 = vld [vmem:[%s2086_s6 + $0xe8] sm:$0xff] }
  0x45   : > { %1195 = vst [vmem:[%s2109_s21 + $0x20] sm:$0xff] %v683_v11  ;;  %1196 = vst [vmem:[%s2109_s21 + $0x28] sm:$0xff] %v684_v12  ;;  %v693_v30 = vmul.f32 %v2093_v1, %v179_v27  ;;  %v694_v34 = vmul.f32 %v2093_v1, %v180_v31  ;;  %v695_v35 = vmul.f32 %v2093_v1, %v181_v32  ;;  %v195_v61 = vld [vmem:[%s2086_s6 + $0xf0] sm:$0xff]  ;;  %v196_v62 = vld [vmem:[%s2086_s6 + $0xf8] sm:$0xff]  ;;  %p1896_p2 = pnand %p1895_p0, %p1889_p13 }
  0x46   : > { %1197 = vst [vmem:[%s2109_s21 + $0x30] sm:$0xff] %v685_v16  ;;  %1198 = vst [vmem:[%s2109_s21 + $0x38] sm:$0xff] %v686_v17  ;;  %v696_v36 = vmul.f32 %v2093_v1, %v182_v33  ;;  %v697_v40 = vmul.f32 %v2093_v1, %v183_v37  ;;  %v698_v41 = vmul.f32 %v2093_v1, %v184_v38  ;;  %v197_v63 = vld [vmem:[%s2086_s6 + $0x100] sm:$0xff]  ;;  %v198_v4 = vld [vmem:[%s2086_s6 + $0x108] sm:$0xff] }
  0x47   : > { %1199 = vst [vmem:[%s2109_s21 + $0x40] sm:$0xff] %v687_v18  ;;  %1200 = vst [vmem:[%s2109_s21 + $0x48] sm:$0xff] %v688_v22  ;;  %v699_v42 = vmul.f32 %v2093_v1, %v185_v39  ;;  %v700_v46 = vmul.f32 %v2093_v1, %v186_v43  ;;  %v701_v47 = vmul.f32 %v2093_v1, %v187_v44  ;;  %v199_v5 = vld [vmem:[%s2086_s6 + $0x110] sm:$0xff]  ;;  %v200_v6 = vld [vmem:[%s2086_s6 + $0x118] sm:$0xff] }
  0x48   : > { %1201 = vst [vmem:[%s2109_s21 + $0x50] sm:$0xff] %v689_v23  ;;  %1202 = vst [vmem:[%s2109_s21 + $0x58] sm:$0xff] %v690_v24  ;;  %v702_v48 = vmul.f32 %v2093_v1, %v188_v45  ;;  %v703_v52 = vmul.f32 %v2093_v1, %v189_v49  ;;  %v704_v53 = vmul.f32 %v2093_v1, %v190_v50  ;;  %v201_v10 = vld [vmem:[%s2086_s6 + $0x120] sm:$0xff]  ;;  %v202_v11 = vld [vmem:[%s2086_s6 + $0x128] sm:$0xff] }
  0x49   : > { %1203 = vst [vmem:[%s2109_s21 + $0x60] sm:$0xff] %v691_v28  ;;  %1204 = vst [vmem:[%s2109_s21 + $0x68] sm:$0xff] %v692_v29  ;;  %v705_v54 = vmul.f32 %v2093_v1, %v191_v51  ;;  %v706_v58 = vmul.f32 %v2093_v1, %v192_v55  ;;  %v707_v59 = vmul.f32 %v2093_v1, %v193_v56  ;;  %v203_v12 = vld [vmem:[%s2086_s6 + $0x130] sm:$0xff]  ;;  %v204_v16 = vld [vmem:[%s2086_s6 + $0x138] sm:$0xff] }
  0x4a   : > { %1205 = vst [vmem:[%s2109_s21 + $0x70] sm:$0xff] %v693_v30  ;;  %1206 = vst [vmem:[%s2109_s21 + $0x78] sm:$0xff] %v694_v34  ;;  %v708_v60 = vmul.f32 %v2093_v1, %v194_v57  ;;  %v709_v0 = vmul.f32 %v2093_v1, %v195_v61  ;;  %v710_v2 = vmul.f32 %v2093_v1, %v196_v62  ;;  %v205_v17 = vld [vmem:[%s2086_s6 + $0x140] sm:$0xff]  ;;  %v206_v18 = vld [vmem:[%s2086_s6 + $0x148] sm:$0xff] }
  0x4b   : > { %1207 = vst [vmem:[%s2109_s21 + $0x80] sm:$0xff] %v695_v35  ;;  %1208 = vst [vmem:[%s2109_s21 + $0x88] sm:$0xff] %v696_v36  ;;  %v711_v3 = vmul.f32 %v2093_v1, %v197_v63  ;;  %v712_v7 = vmul.f32 %v2093_v1, %v198_v4  ;;  %v713_v8 = vmul.f32 %v2093_v1, %v199_v5  ;;  %v207_v22 = vld [vmem:[%s2086_s6 + $0x150] sm:$0xff]  ;;  %v208_v23 = vld [vmem:[%s2086_s6 + $0x158] sm:$0xff] }
  0x4c   : > { %1209 = vst [vmem:[%s2109_s21 + $0x90] sm:$0xff] %v697_v40  ;;  %1210 = vst [vmem:[%s2109_s21 + $0x98] sm:$0xff] %v698_v41  ;;  %v714_v9 = vmul.f32 %v2093_v1, %v200_v6  ;;  %v715_v13 = vmul.f32 %v2093_v1, %v201_v10  ;;  %v716_v14 = vmul.f32 %v2093_v1, %v202_v11  ;;  %v209_v24 = vld [vmem:[%s2086_s6 + $0x160] sm:$0xff]  ;;  %v210_v28 = vld [vmem:[%s2086_s6 + $0x168] sm:$0xff] }
  0x4d   : > { %1211 = vst [vmem:[%s2109_s21 + $0xa0] sm:$0xff] %v699_v42  ;;  %1212 = vst [vmem:[%s2109_s21 + $0xa8] sm:$0xff] %v700_v46  ;;  %v717_v15 = vmul.f32 %v2093_v1, %v203_v12  ;;  %v718_v19 = vmul.f32 %v2093_v1, %v204_v16  ;;  %v719_v20 = vmul.f32 %v2093_v1, %v205_v17  ;;  %v211_v29 = vld [vmem:[%s2086_s6 + $0x170] sm:$0xff]  ;;  %v212_v30 = vld [vmem:[%s2086_s6 + $0x178] sm:$0xff] }
  0x4e   : > { %1213 = vst [vmem:[%s2109_s21 + $0xb0] sm:$0xff] %v701_v47  ;;  %1214 = vst [vmem:[%s2109_s21 + $0xb8] sm:$0xff] %v702_v48  ;;  %v720_v21 = vmul.f32 %v2093_v1, %v206_v18  ;;  %v721_v25 = vmul.f32 %v2093_v1, %v207_v22  ;;  %v722_v26 = vmul.f32 %v2093_v1, %v208_v23  ;;  %v213_v34 = vld [vmem:[%s2086_s6 + $0x180] sm:$0xff]  ;;  %v214_v35 = vld [vmem:[%s2086_s6 + $0x188] sm:$0xff] }
  0x4f   : > { %1215 = vst [vmem:[%s2109_s21 + $0xc0] sm:$0xff] %v703_v52  ;;  %1216 = vst [vmem:[%s2109_s21 + $0xc8] sm:$0xff] %v704_v53  ;;  %v723_v27 = vmul.f32 %v2093_v1, %v209_v24  ;;  %v724_v31 = vmul.f32 %v2093_v1, %v210_v28  ;;  %v725_v32 = vmul.f32 %v2093_v1, %v211_v29  ;;  %v215_v36 = vld [vmem:[%s2086_s6 + $0x190] sm:$0xff]  ;;  %v216_v40 = vld [vmem:[%s2086_s6 + $0x198] sm:$0xff] }
  0x50   : > { %1217 = vst [vmem:[%s2109_s21 + $0xd0] sm:$0xff] %v705_v54  ;;  %1218 = vst [vmem:[%s2109_s21 + $0xd8] sm:$0xff] %v706_v58  ;;  %v726_v33 = vmul.f32 %v2093_v1, %v212_v30  ;;  %v727_v37 = vmul.f32 %v2093_v1, %v213_v34  ;;  %v728_v38 = vmul.f32 %v2093_v1, %v214_v35  ;;  %v217_v41 = vld [vmem:[%s2086_s6 + $0x1a0] sm:$0xff]  ;;  %v218_v42 = vld [vmem:[%s2086_s6 + $0x1a8] sm:$0xff] }
  0x51   : > { %1219 = vst [vmem:[%s2109_s21 + $0xe0] sm:$0xff] %v707_v59  ;;  %1220 = vst [vmem:[%s2109_s21 + $0xe8] sm:$0xff] %v708_v60  ;;  %v729_v39 = vmul.f32 %v2093_v1, %v215_v36  ;;  %v730_v43 = vmul.f32 %v2093_v1, %v216_v40  ;;  %v731_v44 = vmul.f32 %v2093_v1, %v217_v41  ;;  %v219_v46 = vld [vmem:[%s2086_s6 + $0x1b0] sm:$0xff]  ;;  %v220_v47 = vld [vmem:[%s2086_s6 + $0x1b8] sm:$0xff] }
  0x52   : > { %1221 = vst [vmem:[%s2109_s21 + $0xf0] sm:$0xff] %v709_v0  ;;  %1222 = vst [vmem:[%s2109_s21 + $0xf8] sm:$0xff] %v710_v2  ;;  %v732_v45 = vmul.f32 %v2093_v1, %v218_v42  ;;  %v221_v48 = vld [vmem:[%s2086_s6 + $0x1c0] sm:$0xff]  ;;  %v733_v49 = vmul.f32 %v2093_v1, %v219_v46  ;;  %v734_v50 = vmul.f32 %v2093_v1, %v220_v47  ;;  %v222_v52 = vld [vmem:[%s2086_s6 + $0x1c8] sm:$0xff] }
  0x53   : > { %1223 = vst [vmem:[%s2109_s21 + $0x100] sm:$0xff] %v711_v3  ;;  %1224 = vst [vmem:[%s2109_s21 + $0x108] sm:$0xff] %v712_v7  ;;  %v735_v51 = vmul.f32 %v2093_v1, %v221_v48  ;;  %v223_v53 = vld [vmem:[%s2086_s6 + $0x1d0] sm:$0xff]  ;;  %v224_v54 = vld [vmem:[%s2086_s6 + $0x1d8] sm:$0xff]  ;;  %v736_v55 = vmul.f32 %v2093_v1, %v222_v52 }
  0x54   : > { %1225 = vst [vmem:[%s2109_s21 + $0x110] sm:$0xff] %v713_v8  ;;  %1226 = vst [vmem:[%s2109_s21 + $0x118] sm:$0xff] %v714_v9  ;;  %v737_v56 = vmul.f32 %v2093_v1, %v223_v53  ;;  %v738_v57 = vmul.f32 %v2093_v1, %v224_v54  ;;  %v225_v58 = vld [vmem:[%s2086_s6 + $0x1e0] sm:$0xff]  ;;  %v226_v59 = vld [vmem:[%s2086_s6 + $0x1e8] sm:$0xff] }
  0x55   : > { %1227 = vst [vmem:[%s2109_s21 + $0x120] sm:$0xff] %v715_v13  ;;  %1228 = vst [vmem:[%s2109_s21 + $0x128] sm:$0xff] %v716_v14  ;;  %v227_v60 = vld [vmem:[%s2086_s6 + $0x1f0] sm:$0xff]  ;;  %v739_v61 = vmul.f32 %v2093_v1, %v225_v58  ;;  %v740_v62 = vmul.f32 %v2093_v1, %v226_v59  ;;  %v228_v0 = vld [vmem:[%s2086_s6 + $0x1f8] sm:$0xff] }
  0x56   : > { %1229 = vst [vmem:[%s2109_s21 + $0x130] sm:$0xff] %v717_v15  ;;  %1230 = vst [vmem:[%s2109_s21 + $0x138] sm:$0xff] %v718_v19  ;;  %v741_v63 = vmul.f32 %v2093_v1, %v227_v60  ;;  %v229_v2 = vld [vmem:[%s2086_s6 + $0x200] sm:$0xff]  ;;  %v230_v3 = vld [vmem:[%s2086_s6 + $0x208] sm:$0xff]  ;;  %v742_v4 = vmul.f32 %v2093_v1, %v228_v0 }
  0x57   : > { %1231 = vst [vmem:[%s2109_s21 + $0x140] sm:$0xff] %v719_v20  ;;  %1232 = vst [vmem:[%s2109_s21 + $0x148] sm:$0xff] %v720_v21  ;;  %v743_v5 = vmul.f32 %v2093_v1, %v229_v2  ;;  %v744_v6 = vmul.f32 %v2093_v1, %v230_v3  ;;  %v231_v7 = vld [vmem:[%s2086_s6 + $0x210] sm:$0xff]  ;;  %v232_v8 = vld [vmem:[%s2086_s6 + $0x218] sm:$0xff] }
  0x58   : > { %1233 = vst [vmem:[%s2109_s21 + $0x150] sm:$0xff] %v721_v25  ;;  %1234 = vst [vmem:[%s2109_s21 + $0x158] sm:$0xff] %v722_v26  ;;  %v233_v9 = vld [vmem:[%s2086_s6 + $0x220] sm:$0xff]  ;;  %v745_v10 = vmul.f32 %v2093_v1, %v231_v7  ;;  %v746_v11 = vmul.f32 %v2093_v1, %v232_v8  ;;  %v234_v13 = vld [vmem:[%s2086_s6 + $0x228] sm:$0xff] }
  0x59   : > { %1235 = vst [vmem:[%s2109_s21 + $0x160] sm:$0xff] %v723_v27  ;;  %1236 = vst [vmem:[%s2109_s21 + $0x168] sm:$0xff] %v724_v31  ;;  %v747_v12 = vmul.f32 %v2093_v1, %v233_v9  ;;  %v235_v14 = vld [vmem:[%s2086_s6 + $0x230] sm:$0xff]  ;;  %v236_v15 = vld [vmem:[%s2086_s6 + $0x238] sm:$0xff]  ;;  %v748_v16 = vmul.f32 %v2093_v1, %v234_v13 }
  0x5a   : > { %1237 = vst [vmem:[%s2109_s21 + $0x170] sm:$0xff] %v725_v32  ;;  %1238 = vst [vmem:[%s2109_s21 + $0x178] sm:$0xff] %v726_v33  ;;  %v749_v17 = vmul.f32 %v2093_v1, %v235_v14  ;;  %v750_v18 = vmul.f32 %v2093_v1, %v236_v15  ;;  %v237_v19 = vld [vmem:[%s2086_s6 + $0x240] sm:$0xff]  ;;  %v238_v20 = vld [vmem:[%s2086_s6 + $0x248] sm:$0xff] }
  0x5b   : > { %1239 = vst [vmem:[%s2109_s21 + $0x180] sm:$0xff] %v727_v37  ;;  %1240 = vst [vmem:[%s2109_s21 + $0x188] sm:$0xff] %v728_v38  ;;  %v239_v21 = vld [vmem:[%s2086_s6 + $0x250] sm:$0xff]  ;;  %v751_v22 = vmul.f32 %v2093_v1, %v237_v19  ;;  %v752_v23 = vmul.f32 %v2093_v1, %v238_v20  ;;  %v240_v25 = vld [vmem:[%s2086_s6 + $0x258] sm:$0xff] }
  0x5c   : > { %1241 = vst [vmem:[%s2109_s21 + $0x190] sm:$0xff] %v729_v39  ;;  %1242 = vst [vmem:[%s2109_s21 + $0x198] sm:$0xff] %v730_v43  ;;  %v753_v24 = vmul.f32 %v2093_v1, %v239_v21  ;;  %v241_v26 = vld [vmem:[%s2086_s6 + $0x260] sm:$0xff]  ;;  %v242_v27 = vld [vmem:[%s2086_s6 + $0x268] sm:$0xff]  ;;  %v754_v28 = vmul.f32 %v2093_v1, %v240_v25 }
  0x5d   : > { %1243 = vst [vmem:[%s2109_s21 + $0x1a0] sm:$0xff] %v731_v44  ;;  %1244 = vst [vmem:[%s2109_s21 + $0x1a8] sm:$0xff] %v732_v45  ;;  %v755_v29 = vmul.f32 %v2093_v1, %v241_v26  ;;  %v756_v30 = vmul.f32 %v2093_v1, %v242_v27  ;;  %v243_v31 = vld [vmem:[%s2086_s6 + $0x270] sm:$0xff]  ;;  %v244_v32 = vld [vmem:[%s2086_s6 + $0x278] sm:$0xff] }
  0x5e   : > { %1245 = vst [vmem:[%s2109_s21 + $0x1b0] sm:$0xff] %v733_v49  ;;  %1246 = vst [vmem:[%s2109_s21 + $0x1b8] sm:$0xff] %v734_v50  ;;  %v245_v33 = vld [vmem:[%s2086_s6 + $0x280] sm:$0xff]  ;;  %v757_v34 = vmul.f32 %v2093_v1, %v243_v31  ;;  %v758_v35 = vmul.f32 %v2093_v1, %v244_v32  ;;  %v246_v37 = vld [vmem:[%s2086_s6 + $0x288] sm:$0xff] }
  0x5f   : > { %1247 = vst [vmem:[%s2109_s21 + $0x1c0] sm:$0xff] %v735_v51  ;;  %1248 = vst [vmem:[%s2109_s21 + $0x1c8] sm:$0xff] %v736_v55  ;;  %v759_v36 = vmul.f32 %v2093_v1, %v245_v33  ;;  %v247_v38 = vld [vmem:[%s2086_s6 + $0x290] sm:$0xff]  ;;  %v248_v39 = vld [vmem:[%s2086_s6 + $0x298] sm:$0xff]  ;;  %v760_v40 = vmul.f32 %v2093_v1, %v246_v37 }
  0x60   : > { %1249 = vst [vmem:[%s2109_s21 + $0x1d0] sm:$0xff] %v737_v56  ;;  %1250 = vst [vmem:[%s2109_s21 + $0x1d8] sm:$0xff] %v738_v57  ;;  %v761_v41 = vmul.f32 %v2093_v1, %v247_v38  ;;  %v762_v42 = vmul.f32 %v2093_v1, %v248_v39  ;;  %v249_v43 = vld [vmem:[%s2086_s6 + $0x2a0] sm:$0xff]  ;;  %v250_v44 = vld [vmem:[%s2086_s6 + $0x2a8] sm:$0xff] }
  0x61   : > { %1251 = vst [vmem:[%s2109_s21 + $0x1e0] sm:$0xff] %v739_v61  ;;  %1252 = vst [vmem:[%s2109_s21 + $0x1e8] sm:$0xff] %v740_v62  ;;  %v251_v45 = vld [vmem:[%s2086_s6 + $0x2b0] sm:$0xff]  ;;  %v763_v46 = vmul.f32 %v2093_v1, %v249_v43  ;;  %v764_v47 = vmul.f32 %v2093_v1, %v250_v44  ;;  %v252_v49 = vld [vmem:[%s2086_s6 + $0x2b8] sm:$0xff] }
  0x62   : > { %1253 = vst [vmem:[%s2109_s21 + $0x1f0] sm:$0xff] %v741_v63  ;;  %1254 = vst [vmem:[%s2109_s21 + $0x1f8] sm:$0xff] %v742_v4  ;;  %v765_v48 = vmul.f32 %v2093_v1, %v251_v45  ;;  %v253_v50 = vld [vmem:[%s2086_s6 + $0x2c0] sm:$0xff]  ;;  %v254_v51 = vld [vmem:[%s2086_s6 + $0x2c8] sm:$0xff]  ;;  %v766_v52 = vmul.f32 %v2093_v1, %v252_v49 }
  0x63   : > { %1255 = vst [vmem:[%s2109_s21 + $0x200] sm:$0xff] %v743_v5  ;;  %1256 = vst [vmem:[%s2109_s21 + $0x208] sm:$0xff] %v744_v6  ;;  %v767_v53 = vmul.f32 %v2093_v1, %v253_v50  ;;  %v768_v54 = vmul.f32 %v2093_v1, %v254_v51  ;;  %v255_v55 = vld [vmem:[%s2086_s6 + $0x2d0] sm:$0xff]  ;;  %v256_v56 = vld [vmem:[%s2086_s6 + $0x2d8] sm:$0xff] }
  0x64   : > { %1257 = vst [vmem:[%s2109_s21 + $0x210] sm:$0xff] %v745_v10  ;;  %1258 = vst [vmem:[%s2109_s21 + $0x218] sm:$0xff] %v746_v11  ;;  %v257_v57 = vld [vmem:[%s2086_s6 + $0x2e0] sm:$0xff]  ;;  %v769_v58 = vmul.f32 %v2093_v1, %v255_v55  ;;  %v770_v59 = vmul.f32 %v2093_v1, %v256_v56  ;;  %v258_v61 = vld [vmem:[%s2086_s6 + $0x2e8] sm:$0xff] }
  0x65   : > { %1259 = vst [vmem:[%s2109_s21 + $0x220] sm:$0xff] %v747_v12  ;;  %1260 = vst [vmem:[%s2109_s21 + $0x228] sm:$0xff] %v748_v16  ;;  %v771_v60 = vmul.f32 %v2093_v1, %v257_v57  ;;  %v259_v62 = vld [vmem:[%s2086_s6 + $0x2f0] sm:$0xff]  ;;  %v260_v63 = vld [vmem:[%s2086_s6 + $0x2f8] sm:$0xff]  ;;  %v772_v0 = vmul.f32 %v2093_v1, %v258_v61 }
  0x66   : > { %1261 = vst [vmem:[%s2109_s21 + $0x230] sm:$0xff] %v749_v17  ;;  %1262 = vst [vmem:[%s2109_s21 + $0x238] sm:$0xff] %v750_v18  ;;  %v773_v2 = vmul.f32 %v2093_v1, %v259_v62  ;;  %v774_v3 = vmul.f32 %v2093_v1, %v260_v63  ;;  %v261_v4 = vld [vmem:[%s2086_s6 + $0x300] sm:$0xff]  ;;  %v262_v5 = vld [vmem:[%s2086_s6 + $0x308] sm:$0xff] }
  0x67   : > { %1263 = vst [vmem:[%s2109_s21 + $0x240] sm:$0xff] %v751_v22  ;;  %1264 = vst [vmem:[%s2109_s21 + $0x248] sm:$0xff] %v752_v23  ;;  %v263_v6 = vld [vmem:[%s2086_s6 + $0x310] sm:$0xff]  ;;  %v775_v7 = vmul.f32 %v2093_v1, %v261_v4  ;;  %v776_v8 = vmul.f32 %v2093_v1, %v262_v5  ;;  %v264_v10 = vld [vmem:[%s2086_s6 + $0x318] sm:$0xff] }
  0x68   : > { %1265 = vst [vmem:[%s2109_s21 + $0x250] sm:$0xff] %v753_v24  ;;  %1266 = vst [vmem:[%s2109_s21 + $0x258] sm:$0xff] %v754_v28  ;;  %v777_v9 = vmul.f32 %v2093_v1, %v263_v6  ;;  %v265_v11 = vld [vmem:[%s2086_s6 + $0x320] sm:$0xff]  ;;  %v266_v12 = vld [vmem:[%s2086_s6 + $0x328] sm:$0xff]  ;;  %v778_v13 = vmul.f32 %v2093_v1, %v264_v10 }
  0x69   : > { %1267 = vst [vmem:[%s2109_s21 + $0x260] sm:$0xff] %v755_v29  ;;  %1268 = vst [vmem:[%s2109_s21 + $0x268] sm:$0xff] %v756_v30  ;;  %v779_v14 = vmul.f32 %v2093_v1, %v265_v11  ;;  %v780_v15 = vmul.f32 %v2093_v1, %v266_v12  ;;  %v267_v16 = vld [vmem:[%s2086_s6 + $0x330] sm:$0xff]  ;;  %v268_v17 = vld [vmem:[%s2086_s6 + $0x338] sm:$0xff] }
  0x6a   : > { %1269 = vst [vmem:[%s2109_s21 + $0x270] sm:$0xff] %v757_v34  ;;  %1270 = vst [vmem:[%s2109_s21 + $0x278] sm:$0xff] %v758_v35  ;;  %v269_v18 = vld [vmem:[%s2086_s6 + $0x340] sm:$0xff]  ;;  %v781_v19 = vmul.f32 %v2093_v1, %v267_v16  ;;  %v782_v20 = vmul.f32 %v2093_v1, %v268_v17  ;;  %v270_v22 = vld [vmem:[%s2086_s6 + $0x348] sm:$0xff] }
  0x6b   : > { %1271 = vst [vmem:[%s2109_s21 + $0x280] sm:$0xff] %v759_v36  ;;  %1272 = vst [vmem:[%s2109_s21 + $0x288] sm:$0xff] %v760_v40  ;;  %v783_v21 = vmul.f32 %v2093_v1, %v269_v18  ;;  %v271_v23 = vld [vmem:[%s2086_s6 + $0x350] sm:$0xff]  ;;  %v272_v24 = vld [vmem:[%s2086_s6 + $0x358] sm:$0xff]  ;;  %v784_v25 = vmul.f32 %v2093_v1, %v270_v22 }
  0x6c   : > { %1273 = vst [vmem:[%s2109_s21 + $0x290] sm:$0xff] %v761_v41  ;;  %1274 = vst [vmem:[%s2109_s21 + $0x298] sm:$0xff] %v762_v42  ;;  %v785_v26 = vmul.f32 %v2093_v1, %v271_v23  ;;  %v786_v27 = vmul.f32 %v2093_v1, %v272_v24  ;;  %v273_v28 = vld [vmem:[%s2086_s6 + $0x360] sm:$0xff]  ;;  %v274_v29 = vld [vmem:[%s2086_s6 + $0x368] sm:$0xff] }
  0x6d   : > { %1275 = vst [vmem:[%s2109_s21 + $0x2a0] sm:$0xff] %v763_v46  ;;  %1276 = vst [vmem:[%s2109_s21 + $0x2a8] sm:$0xff] %v764_v47  ;;  %v275_v30 = vld [vmem:[%s2086_s6 + $0x370] sm:$0xff]  ;;  %v787_v31 = vmul.f32 %v2093_v1, %v273_v28  ;;  %v788_v32 = vmul.f32 %v2093_v1, %v274_v29  ;;  %v276_v34 = vld [vmem:[%s2086_s6 + $0x378] sm:$0xff] }
  0x6e   : > { %1277 = vst [vmem:[%s2109_s21 + $0x2b0] sm:$0xff] %v765_v48  ;;  %1278 = vst [vmem:[%s2109_s21 + $0x2b8] sm:$0xff] %v766_v52  ;;  %v789_v33 = vmul.f32 %v2093_v1, %v275_v30  ;;  %v277_v35 = vld [vmem:[%s2086_s6 + $0x380] sm:$0xff]  ;;  %v278_v36 = vld [vmem:[%s2086_s6 + $0x388] sm:$0xff]  ;;  %v790_v37 = vmul.f32 %v2093_v1, %v276_v34 }
  0x6f   : > { %1279 = vst [vmem:[%s2109_s21 + $0x2c0] sm:$0xff] %v767_v53  ;;  %1280 = vst [vmem:[%s2109_s21 + $0x2c8] sm:$0xff] %v768_v54  ;;  %v791_v38 = vmul.f32 %v2093_v1, %v277_v35  ;;  %v792_v39 = vmul.f32 %v2093_v1, %v278_v36  ;;  %v279_v40 = vld [vmem:[%s2086_s6 + $0x390] sm:$0xff]  ;;  %v280_v41 = vld [vmem:[%s2086_s6 + $0x398] sm:$0xff] }
  0x70   : > { %1281 = vst [vmem:[%s2109_s21 + $0x2d0] sm:$0xff] %v769_v58  ;;  %1282 = vst [vmem:[%s2109_s21 + $0x2d8] sm:$0xff] %v770_v59  ;;  %v281_v42 = vld [vmem:[%s2086_s6 + $0x3a0] sm:$0xff]  ;;  %v793_v43 = vmul.f32 %v2093_v1, %v279_v40  ;;  %v794_v44 = vmul.f32 %v2093_v1, %v280_v41  ;;  %v282_v46 = vld [vmem:[%s2086_s6 + $0x3a8] sm:$0xff] }
  0x71   : > { %1283 = vst [vmem:[%s2109_s21 + $0x2e0] sm:$0xff] %v771_v60  ;;  %1284 = vst [vmem:[%s2109_s21 + $0x2e8] sm:$0xff] %v772_v0  ;;  %v795_v45 = vmul.f32 %v2093_v1, %v281_v42  ;;  %v283_v47 = vld [vmem:[%s2086_s6 + $0x3b0] sm:$0xff]  ;;  %v284_v48 = vld [vmem:[%s2086_s6 + $0x3b8] sm:$0xff]  ;;  %v796_v49 = vmul.f32 %v2093_v1, %v282_v46 }
  0x72   : > { %1285 = vst [vmem:[%s2109_s21 + $0x2f0] sm:$0xff] %v773_v2  ;;  %1286 = vst [vmem:[%s2109_s21 + $0x2f8] sm:$0xff] %v774_v3  ;;  %v797_v50 = vmul.f32 %v2093_v1, %v283_v47  ;;  %v798_v51 = vmul.f32 %v2093_v1, %v284_v48  ;;  %v285_v52 = vld [vmem:[%s2086_s6 + $0x3c0] sm:$0xff]  ;;  %v286_v53 = vld [vmem:[%s2086_s6 + $0x3c8] sm:$0xff] }
  0x73   : > { %1287 = vst [vmem:[%s2109_s21 + $0x300] sm:$0xff] %v775_v7  ;;  %1288 = vst [vmem:[%s2109_s21 + $0x308] sm:$0xff] %v776_v8  ;;  %v287_v54 = vld [vmem:[%s2086_s6 + $0x3d0] sm:$0xff]  ;;  %v799_v55 = vmul.f32 %v2093_v1, %v285_v52  ;;  %v800_v56 = vmul.f32 %v2093_v1, %v286_v53  ;;  %v288_v58 = vld [vmem:[%s2086_s6 + $0x3d8] sm:$0xff] }
  0x74   : > { %1289 = vst [vmem:[%s2109_s21 + $0x310] sm:$0xff] %v777_v9  ;;  %1290 = vst [vmem:[%s2109_s21 + $0x318] sm:$0xff] %v778_v13  ;;  %v801_v57 = vmul.f32 %v2093_v1, %v287_v54  ;;  %v289_v59 = vld [vmem:[%s2086_s6 + $0x3e0] sm:$0xff]  ;;  %v290_v60 = vld [vmem:[%s2086_s6 + $0x3e8] sm:$0xff]  ;;  %v802_v61 = vmul.f32 %v2093_v1, %v288_v58 }
  0x75   : > { %1291 = vst [vmem:[%s2109_s21 + $0x320] sm:$0xff] %v779_v14  ;;  %1292 = vst [vmem:[%s2109_s21 + $0x328] sm:$0xff] %v780_v15  ;;  %v803_v62 = vmul.f32 %v2093_v1, %v289_v59  ;;  %v804_v63 = vmul.f32 %v2093_v1, %v290_v60  ;;  %v291_v0 = vld [vmem:[%s2086_s6 + $0x3f0] sm:$0xff]  ;;  %v292_v2 = vld [vmem:[%s2086_s6 + $0x3f8] sm:$0xff] }
  0x76   : > { %1293 = vst [vmem:[%s2109_s21 + $0x330] sm:$0xff] %v781_v19  ;;  %1294 = vst [vmem:[%s2109_s21 + $0x338] sm:$0xff] %v782_v20  ;;  %v293_v3 = vld [vmem:[%s2086_s6 + $0x400] sm:$0xff]  ;;  %v805_v4 = vmul.f32 %v2093_v1, %v291_v0  ;;  %v806_v5 = vmul.f32 %v2093_v1, %v292_v2  ;;  %v294_v7 = vld [vmem:[%s2086_s6 + $0x408] sm:$0xff] }
  0x77   : > { %1295 = vst [vmem:[%s2109_s21 + $0x340] sm:$0xff] %v783_v21  ;;  %1296 = vst [vmem:[%s2109_s21 + $0x348] sm:$0xff] %v784_v25  ;;  %v807_v6 = vmul.f32 %v2093_v1, %v293_v3  ;;  %v295_v8 = vld [vmem:[%s2086_s6 + $0x410] sm:$0xff]  ;;  %v296_v9 = vld [vmem:[%s2086_s6 + $0x418] sm:$0xff]  ;;  %v808_v10 = vmul.f32 %v2093_v1, %v294_v7 }
  0x78   : > { %1297 = vst [vmem:[%s2109_s21 + $0x350] sm:$0xff] %v785_v26  ;;  %1298 = vst [vmem:[%s2109_s21 + $0x358] sm:$0xff] %v786_v27  ;;  %v809_v11 = vmul.f32 %v2093_v1, %v295_v8  ;;  %v810_v12 = vmul.f32 %v2093_v1, %v296_v9  ;;  %v297_v13 = vld [vmem:[%s2086_s6 + $0x420] sm:$0xff]  ;;  %v298_v14 = vld [vmem:[%s2086_s6 + $0x428] sm:$0xff] }
  0x79   : > { %1299 = vst [vmem:[%s2109_s21 + $0x360] sm:$0xff] %v787_v31  ;;  %1300 = vst [vmem:[%s2109_s21 + $0x368] sm:$0xff] %v788_v32  ;;  %v299_v15 = vld [vmem:[%s2086_s6 + $0x430] sm:$0xff]  ;;  %v811_v16 = vmul.f32 %v2093_v1, %v297_v13  ;;  %v812_v17 = vmul.f32 %v2093_v1, %v298_v14  ;;  %v300_v19 = vld [vmem:[%s2086_s6 + $0x438] sm:$0xff] }
  0x7a   : > { %1301 = vst [vmem:[%s2109_s21 + $0x370] sm:$0xff] %v789_v33  ;;  %1302 = vst [vmem:[%s2109_s21 + $0x378] sm:$0xff] %v790_v37  ;;  %v813_v18 = vmul.f32 %v2093_v1, %v299_v15  ;;  %v301_v20 = vld [vmem:[%s2086_s6 + $0x440] sm:$0xff]  ;;  %v302_v21 = vld [vmem:[%s2086_s6 + $0x448] sm:$0xff]  ;;  %v814_v22 = vmul.f32 %v2093_v1, %v300_v19 }
  0x7b   : > { %1303 = vst [vmem:[%s2109_s21 + $0x380] sm:$0xff] %v791_v38  ;;  %1304 = vst [vmem:[%s2109_s21 + $0x388] sm:$0xff] %v792_v39  ;;  %v815_v23 = vmul.f32 %v2093_v1, %v301_v20  ;;  %v816_v24 = vmul.f32 %v2093_v1, %v302_v21  ;;  %v303_v25 = vld [vmem:[%s2086_s6 + $0x450] sm:$0xff]  ;;  %v304_v26 = vld [vmem:[%s2086_s6 + $0x458] sm:$0xff] }
  0x7c   : > { %1305 = vst [vmem:[%s2109_s21 + $0x390] sm:$0xff] %v793_v43  ;;  %1306 = vst [vmem:[%s2109_s21 + $0x398] sm:$0xff] %v794_v44  ;;  %v305_v27 = vld [vmem:[%s2086_s6 + $0x460] sm:$0xff]  ;;  %v817_v28 = vmul.f32 %v2093_v1, %v303_v25  ;;  %v818_v29 = vmul.f32 %v2093_v1, %v304_v26  ;;  %v306_v31 = vld [vmem:[%s2086_s6 + $0x468] sm:$0xff] }
  0x7d   : > { %1307 = vst [vmem:[%s2109_s21 + $0x3a0] sm:$0xff] %v795_v45  ;;  %1308 = vst [vmem:[%s2109_s21 + $0x3a8] sm:$0xff] %v796_v49  ;;  %v819_v30 = vmul.f32 %v2093_v1, %v305_v27  ;;  %v307_v32 = vld [vmem:[%s2086_s6 + $0x470] sm:$0xff]  ;;  %v308_v33 = vld [vmem:[%s2086_s6 + $0x478] sm:$0xff]  ;;  %v820_v34 = vmul.f32 %v2093_v1, %v306_v31 }
  0x7e   : > { %1309 = vst [vmem:[%s2109_s21 + $0x3b0] sm:$0xff] %v797_v50  ;;  %1310 = vst [vmem:[%s2109_s21 + $0x3b8] sm:$0xff] %v798_v51  ;;  %v821_v35 = vmul.f32 %v2093_v1, %v307_v32  ;;  %v822_v36 = vmul.f32 %v2093_v1, %v308_v33  ;;  %v309_v37 = vld [vmem:[%s2086_s6 + $0x480] sm:$0xff]  ;;  %v310_v38 = vld [vmem:[%s2086_s6 + $0x488] sm:$0xff] }
  0x7f   : > { %1311 = vst [vmem:[%s2109_s21 + $0x3c0] sm:$0xff] %v799_v55  ;;  %1312 = vst [vmem:[%s2109_s21 + $0x3c8] sm:$0xff] %v800_v56  ;;  %v311_v39 = vld [vmem:[%s2086_s6 + $0x490] sm:$0xff]  ;;  %v823_v40 = vmul.f32 %v2093_v1, %v309_v37  ;;  %v824_v41 = vmul.f32 %v2093_v1, %v310_v38  ;;  %v312_v43 = vld [vmem:[%s2086_s6 + $0x498] sm:$0xff] }
  0x80   : > { %1313 = vst [vmem:[%s2109_s21 + $0x3d0] sm:$0xff] %v801_v57  ;;  %1314 = vst [vmem:[%s2109_s21 + $0x3d8] sm:$0xff] %v802_v61  ;;  %v825_v42 = vmul.f32 %v2093_v1, %v311_v39  ;;  %v313_v44 = vld [vmem:[%s2086_s6 + $0x4a0] sm:$0xff]  ;;  %v314_v45 = vld [vmem:[%s2086_s6 + $0x4a8] sm:$0xff]  ;;  %v826_v46 = vmul.f32 %v2093_v1, %v312_v43 }
  0x81   : > { %1315 = vst [vmem:[%s2109_s21 + $0x3e0] sm:$0xff] %v803_v62  ;;  %1316 = vst [vmem:[%s2109_s21 + $0x3e8] sm:$0xff] %v804_v63  ;;  %v827_v47 = vmul.f32 %v2093_v1, %v313_v44  ;;  %v828_v48 = vmul.f32 %v2093_v1, %v314_v45  ;;  %v315_v49 = vld [vmem:[%s2086_s6 + $0x4b0] sm:$0xff]  ;;  %v316_v50 = vld [vmem:[%s2086_s6 + $0x4b8] sm:$0xff] }
  0x82   : > { %1317 = vst [vmem:[%s2109_s21 + $0x3f0] sm:$0xff] %v805_v4  ;;  %1318 = vst [vmem:[%s2109_s21 + $0x3f8] sm:$0xff] %v806_v5  ;;  %v317_v51 = vld [vmem:[%s2086_s6 + $0x4c0] sm:$0xff]  ;;  %v829_v52 = vmul.f32 %v2093_v1, %v315_v49  ;;  %v830_v53 = vmul.f32 %v2093_v1, %v316_v50  ;;  %v318_v55 = vld [vmem:[%s2086_s6 + $0x4c8] sm:$0xff] }
  0x83   : > { %1319 = vst [vmem:[%s2109_s21 + $0x400] sm:$0xff] %v807_v6  ;;  %1320 = vst [vmem:[%s2109_s21 + $0x408] sm:$0xff] %v808_v10  ;;  %v831_v54 = vmul.f32 %v2093_v1, %v317_v51  ;;  %v319_v56 = vld [vmem:[%s2086_s6 + $0x4d0] sm:$0xff]  ;;  %v320_v57 = vld [vmem:[%s2086_s6 + $0x4d8] sm:$0xff]  ;;  %v832_v58 = vmul.f32 %v2093_v1, %v318_v55 }
  0x84   : > { %1321 = vst [vmem:[%s2109_s21 + $0x410] sm:$0xff] %v809_v11  ;;  %1322 = vst [vmem:[%s2109_s21 + $0x418] sm:$0xff] %v810_v12  ;;  %v833_v59 = vmul.f32 %v2093_v1, %v319_v56  ;;  %v834_v60 = vmul.f32 %v2093_v1, %v320_v57  ;;  %v321_v61 = vld [vmem:[%s2086_s6 + $0x4e0] sm:$0xff]  ;;  %v322_v62 = vld [vmem:[%s2086_s6 + $0x4e8] sm:$0xff] }
  0x85   : > { %1323 = vst [vmem:[%s2109_s21 + $0x420] sm:$0xff] %v811_v16  ;;  %1324 = vst [vmem:[%s2109_s21 + $0x428] sm:$0xff] %v812_v17  ;;  %v323_v63 = vld [vmem:[%s2086_s6 + $0x4f0] sm:$0xff]  ;;  %v835_v0 = vmul.f32 %v2093_v1, %v321_v61  ;;  %v836_v2 = vmul.f32 %v2093_v1, %v322_v62  ;;  %v324_v4 = vld [vmem:[%s2086_s6 + $0x4f8] sm:$0xff] }
  0x86   : > { %1325 = vst [vmem:[%s2109_s21 + $0x430] sm:$0xff] %v813_v18  ;;  %1326 = vst [vmem:[%s2109_s21 + $0x438] sm:$0xff] %v814_v22  ;;  %v837_v3 = vmul.f32 %v2093_v1, %v323_v63  ;;  %v325_v5 = vld [vmem:[%s2086_s6 + $0x500] sm:$0xff]  ;;  %v326_v6 = vld [vmem:[%s2086_s6 + $0x508] sm:$0xff]  ;;  %v838_v7 = vmul.f32 %v2093_v1, %v324_v4 }
  0x87   : > { %1327 = vst [vmem:[%s2109_s21 + $0x440] sm:$0xff] %v815_v23  ;;  %1328 = vst [vmem:[%s2109_s21 + $0x448] sm:$0xff] %v816_v24  ;;  %v839_v8 = vmul.f32 %v2093_v1, %v325_v5  ;;  %v840_v9 = vmul.f32 %v2093_v1, %v326_v6  ;;  %v327_v10 = vld [vmem:[%s2086_s6 + $0x510] sm:$0xff]  ;;  %v328_v11 = vld [vmem:[%s2086_s6 + $0x518] sm:$0xff] }
  0x88   : > { %1329 = vst [vmem:[%s2109_s21 + $0x450] sm:$0xff] %v817_v28  ;;  %1330 = vst [vmem:[%s2109_s21 + $0x458] sm:$0xff] %v818_v29  ;;  %v329_v12 = vld [vmem:[%s2086_s6 + $0x520] sm:$0xff]  ;;  %v841_v13 = vmul.f32 %v2093_v1, %v327_v10  ;;  %v842_v14 = vmul.f32 %v2093_v1, %v328_v11  ;;  %v330_v16 = vld [vmem:[%s2086_s6 + $0x528] sm:$0xff] }
  0x89   : > { %1331 = vst [vmem:[%s2109_s21 + $0x460] sm:$0xff] %v819_v30  ;;  %1332 = vst [vmem:[%s2109_s21 + $0x468] sm:$0xff] %v820_v34  ;;  %v843_v15 = vmul.f32 %v2093_v1, %v329_v12  ;;  %v331_v17 = vld [vmem:[%s2086_s6 + $0x530] sm:$0xff]  ;;  %v332_v18 = vld [vmem:[%s2086_s6 + $0x538] sm:$0xff]  ;;  %v844_v19 = vmul.f32 %v2093_v1, %v330_v16 }
  0x8a   : > { %1333 = vst [vmem:[%s2109_s21 + $0x470] sm:$0xff] %v821_v35  ;;  %1334 = vst [vmem:[%s2109_s21 + $0x478] sm:$0xff] %v822_v36  ;;  %v845_v20 = vmul.f32 %v2093_v1, %v331_v17  ;;  %v846_v21 = vmul.f32 %v2093_v1, %v332_v18  ;;  %v333_v22 = vld [vmem:[%s2086_s6 + $0x540] sm:$0xff]  ;;  %v334_v23 = vld [vmem:[%s2086_s6 + $0x548] sm:$0xff] }
  0x8b   : > { %1335 = vst [vmem:[%s2109_s21 + $0x480] sm:$0xff] %v823_v40  ;;  %1336 = vst [vmem:[%s2109_s21 + $0x488] sm:$0xff] %v824_v41  ;;  %v335_v24 = vld [vmem:[%s2086_s6 + $0x550] sm:$0xff]  ;;  %v847_v25 = vmul.f32 %v2093_v1, %v333_v22  ;;  %v848_v26 = vmul.f32 %v2093_v1, %v334_v23  ;;  %v336_v28 = vld [vmem:[%s2086_s6 + $0x558] sm:$0xff] }
  0x8c   : > { %1337 = vst [vmem:[%s2109_s21 + $0x490] sm:$0xff] %v825_v42  ;;  %1338 = vst [vmem:[%s2109_s21 + $0x498] sm:$0xff] %v826_v46  ;;  %v849_v27 = vmul.f32 %v2093_v1, %v335_v24  ;;  %v337_v29 = vld [vmem:[%s2086_s6 + $0x560] sm:$0xff]  ;;  %v338_v30 = vld [vmem:[%s2086_s6 + $0x568] sm:$0xff]  ;;  %v850_v31 = vmul.f32 %v2093_v1, %v336_v28 }
  0x8d   : > { %1339 = vst [vmem:[%s2109_s21 + $0x4a0] sm:$0xff] %v827_v47  ;;  %1340 = vst [vmem:[%s2109_s21 + $0x4a8] sm:$0xff] %v828_v48  ;;  %v851_v32 = vmul.f32 %v2093_v1, %v337_v29  ;;  %v852_v33 = vmul.f32 %v2093_v1, %v338_v30  ;;  %v339_v34 = vld [vmem:[%s2086_s6 + $0x570] sm:$0xff]  ;;  %v340_v35 = vld [vmem:[%s2086_s6 + $0x578] sm:$0xff] }
  0x8e   : > { %1341 = vst [vmem:[%s2109_s21 + $0x4b0] sm:$0xff] %v829_v52  ;;  %1342 = vst [vmem:[%s2109_s21 + $0x4b8] sm:$0xff] %v830_v53  ;;  %v341_v36 = vld [vmem:[%s2086_s6 + $0x580] sm:$0xff]  ;;  %v853_v37 = vmul.f32 %v2093_v1, %v339_v34  ;;  %v854_v38 = vmul.f32 %v2093_v1, %v340_v35  ;;  %v342_v40 = vld [vmem:[%s2086_s6 + $0x588] sm:$0xff] }
  0x8f   : > { %1343 = vst [vmem:[%s2109_s21 + $0x4c0] sm:$0xff] %v831_v54  ;;  %1344 = vst [vmem:[%s2109_s21 + $0x4c8] sm:$0xff] %v832_v58  ;;  %v855_v39 = vmul.f32 %v2093_v1, %v341_v36  ;;  %v343_v41 = vld [vmem:[%s2086_s6 + $0x590] sm:$0xff]  ;;  %v344_v42 = vld [vmem:[%s2086_s6 + $0x598] sm:$0xff]  ;;  %v856_v43 = vmul.f32 %v2093_v1, %v342_v40 }
  0x90   : > { %1345 = vst [vmem:[%s2109_s21 + $0x4d0] sm:$0xff] %v833_v59  ;;  %1346 = vst [vmem:[%s2109_s21 + $0x4d8] sm:$0xff] %v834_v60  ;;  %v857_v44 = vmul.f32 %v2093_v1, %v343_v41  ;;  %v858_v45 = vmul.f32 %v2093_v1, %v344_v42  ;;  %v345_v46 = vld [vmem:[%s2086_s6 + $0x5a0] sm:$0xff]  ;;  %v346_v47 = vld [vmem:[%s2086_s6 + $0x5a8] sm:$0xff] }
  0x91   : > { %1347 = vst [vmem:[%s2109_s21 + $0x4e0] sm:$0xff] %v835_v0  ;;  %1348 = vst [vmem:[%s2109_s21 + $0x4e8] sm:$0xff] %v836_v2  ;;  %v347_v48 = vld [vmem:[%s2086_s6 + $0x5b0] sm:$0xff]  ;;  %v859_v49 = vmul.f32 %v2093_v1, %v345_v46  ;;  %v860_v50 = vmul.f32 %v2093_v1, %v346_v47  ;;  %v348_v52 = vld [vmem:[%s2086_s6 + $0x5b8] sm:$0xff] }
  0x92   : > { %1349 = vst [vmem:[%s2109_s21 + $0x4f0] sm:$0xff] %v837_v3  ;;  %1350 = vst [vmem:[%s2109_s21 + $0x4f8] sm:$0xff] %v838_v7  ;;  %v861_v51 = vmul.f32 %v2093_v1, %v347_v48  ;;  %v349_v53 = vld [vmem:[%s2086_s6 + $0x5c0] sm:$0xff]  ;;  %v350_v54 = vld [vmem:[%s2086_s6 + $0x5c8] sm:$0xff]  ;;  %v862_v55 = vmul.f32 %v2093_v1, %v348_v52 }
  0x93   : > { %1351 = vst [vmem:[%s2109_s21 + $0x500] sm:$0xff] %v839_v8  ;;  %1352 = vst [vmem:[%s2109_s21 + $0x508] sm:$0xff] %v840_v9  ;;  %v863_v56 = vmul.f32 %v2093_v1, %v349_v53  ;;  %v864_v57 = vmul.f32 %v2093_v1, %v350_v54  ;;  %v351_v58 = vld [vmem:[%s2086_s6 + $0x5d0] sm:$0xff]  ;;  %v352_v59 = vld [vmem:[%s2086_s6 + $0x5d8] sm:$0xff] }
  0x94   : > { %1353 = vst [vmem:[%s2109_s21 + $0x510] sm:$0xff] %v841_v13  ;;  %1354 = vst [vmem:[%s2109_s21 + $0x518] sm:$0xff] %v842_v14  ;;  %v353_v60 = vld [vmem:[%s2086_s6 + $0x5e0] sm:$0xff]  ;;  %v865_v61 = vmul.f32 %v2093_v1, %v351_v58  ;;  %v866_v62 = vmul.f32 %v2093_v1, %v352_v59  ;;  %v354_v0 = vld [vmem:[%s2086_s6 + $0x5e8] sm:$0xff] }
  0x95   : > { %1355 = vst [vmem:[%s2109_s21 + $0x520] sm:$0xff] %v843_v15  ;;  %1356 = vst [vmem:[%s2109_s21 + $0x528] sm:$0xff] %v844_v19  ;;  %v867_v63 = vmul.f32 %v2093_v1, %v353_v60  ;;  %v355_v2 = vld [vmem:[%s2086_s6 + $0x5f0] sm:$0xff]  ;;  %v356_v3 = vld [vmem:[%s2086_s6 + $0x5f8] sm:$0xff]  ;;  %v868_v4 = vmul.f32 %v2093_v1, %v354_v0 }
  0x96   : > { %1357 = vst [vmem:[%s2109_s21 + $0x530] sm:$0xff] %v845_v20  ;;  %1358 = vst [vmem:[%s2109_s21 + $0x538] sm:$0xff] %v846_v21  ;;  %v869_v5 = vmul.f32 %v2093_v1, %v355_v2  ;;  %v870_v6 = vmul.f32 %v2093_v1, %v356_v3  ;;  %v357_v7 = vld [vmem:[%s2086_s6 + $0x600] sm:$0xff]  ;;  %v358_v8 = vld [vmem:[%s2086_s6 + $0x608] sm:$0xff] }
  0x97   : > { %1359 = vst [vmem:[%s2109_s21 + $0x540] sm:$0xff] %v847_v25  ;;  %1360 = vst [vmem:[%s2109_s21 + $0x548] sm:$0xff] %v848_v26  ;;  %v359_v9 = vld [vmem:[%s2086_s6 + $0x610] sm:$0xff]  ;;  %v871_v10 = vmul.f32 %v2093_v1, %v357_v7  ;;  %v872_v11 = vmul.f32 %v2093_v1, %v358_v8  ;;  %v360_v13 = vld [vmem:[%s2086_s6 + $0x618] sm:$0xff] }
  0x98   : > { %1361 = vst [vmem:[%s2109_s21 + $0x550] sm:$0xff] %v849_v27  ;;  %1362 = vst [vmem:[%s2109_s21 + $0x558] sm:$0xff] %v850_v31  ;;  %v873_v12 = vmul.f32 %v2093_v1, %v359_v9  ;;  %v361_v14 = vld [vmem:[%s2086_s6 + $0x620] sm:$0xff]  ;;  %v362_v15 = vld [vmem:[%s2086_s6 + $0x628] sm:$0xff]  ;;  %v874_v16 = vmul.f32 %v2093_v1, %v360_v13 }
  0x99   : > { %1363 = vst [vmem:[%s2109_s21 + $0x560] sm:$0xff] %v851_v32  ;;  %1364 = vst [vmem:[%s2109_s21 + $0x568] sm:$0xff] %v852_v33  ;;  %v875_v17 = vmul.f32 %v2093_v1, %v361_v14  ;;  %v876_v18 = vmul.f32 %v2093_v1, %v362_v15  ;;  %v363_v19 = vld [vmem:[%s2086_s6 + $0x630] sm:$0xff]  ;;  %v364_v20 = vld [vmem:[%s2086_s6 + $0x638] sm:$0xff] }
  0x9a   : > { %1365 = vst [vmem:[%s2109_s21 + $0x570] sm:$0xff] %v853_v37  ;;  %1366 = vst [vmem:[%s2109_s21 + $0x578] sm:$0xff] %v854_v38  ;;  %v365_v21 = vld [vmem:[%s2086_s6 + $0x640] sm:$0xff]  ;;  %v877_v22 = vmul.f32 %v2093_v1, %v363_v19  ;;  %v878_v23 = vmul.f32 %v2093_v1, %v364_v20  ;;  %v366_v25 = vld [vmem:[%s2086_s6 + $0x648] sm:$0xff] }
  0x9b   : > { %1367 = vst [vmem:[%s2109_s21 + $0x580] sm:$0xff] %v855_v39  ;;  %1368 = vst [vmem:[%s2109_s21 + $0x588] sm:$0xff] %v856_v43  ;;  %v879_v24 = vmul.f32 %v2093_v1, %v365_v21  ;;  %v367_v26 = vld [vmem:[%s2086_s6 + $0x650] sm:$0xff]  ;;  %v368_v27 = vld [vmem:[%s2086_s6 + $0x658] sm:$0xff]  ;;  %v880_v28 = vmul.f32 %v2093_v1, %v366_v25 }
  0x9c   : > { %1369 = vst [vmem:[%s2109_s21 + $0x590] sm:$0xff] %v857_v44  ;;  %1370 = vst [vmem:[%s2109_s21 + $0x598] sm:$0xff] %v858_v45  ;;  %v881_v29 = vmul.f32 %v2093_v1, %v367_v26  ;;  %v882_v30 = vmul.f32 %v2093_v1, %v368_v27  ;;  %v369_v31 = vld [vmem:[%s2086_s6 + $0x660] sm:$0xff]  ;;  %v370_v32 = vld [vmem:[%s2086_s6 + $0x668] sm:$0xff] }
  0x9d   : > { %1371 = vst [vmem:[%s2109_s21 + $0x5a0] sm:$0xff] %v859_v49  ;;  %1372 = vst [vmem:[%s2109_s21 + $0x5a8] sm:$0xff] %v860_v50  ;;  %v371_v33 = vld [vmem:[%s2086_s6 + $0x670] sm:$0xff]  ;;  %v883_v34 = vmul.f32 %v2093_v1, %v369_v31  ;;  %v884_v35 = vmul.f32 %v2093_v1, %v370_v32  ;;  %v372_v37 = vld [vmem:[%s2086_s6 + $0x678] sm:$0xff] }
  0x9e   : > { %1373 = vst [vmem:[%s2109_s21 + $0x5b0] sm:$0xff] %v861_v51  ;;  %1374 = vst [vmem:[%s2109_s21 + $0x5b8] sm:$0xff] %v862_v55  ;;  %v885_v36 = vmul.f32 %v2093_v1, %v371_v33  ;;  %v373_v38 = vld [vmem:[%s2086_s6 + $0x680] sm:$0xff]  ;;  %v374_v39 = vld [vmem:[%s2086_s6 + $0x688] sm:$0xff]  ;;  %v886_v40 = vmul.f32 %v2093_v1, %v372_v37 }
  0x9f   : > { %1375 = vst [vmem:[%s2109_s21 + $0x5c0] sm:$0xff] %v863_v56  ;;  %1376 = vst [vmem:[%s2109_s21 + $0x5c8] sm:$0xff] %v864_v57  ;;  %v887_v41 = vmul.f32 %v2093_v1, %v373_v38  ;;  %v888_v42 = vmul.f32 %v2093_v1, %v374_v39  ;;  %v375_v43 = vld [vmem:[%s2086_s6 + $0x690] sm:$0xff]  ;;  %v376_v44 = vld [vmem:[%s2086_s6 + $0x698] sm:$0xff] }
  0xa0   : > { %1377 = vst [vmem:[%s2109_s21 + $0x5d0] sm:$0xff] %v865_v61  ;;  %1378 = vst [vmem:[%s2109_s21 + $0x5d8] sm:$0xff] %v866_v62  ;;  %v377_v45 = vld [vmem:[%s2086_s6 + $0x6a0] sm:$0xff]  ;;  %v889_v46 = vmul.f32 %v2093_v1, %v375_v43  ;;  %v890_v47 = vmul.f32 %v2093_v1, %v376_v44  ;;  %v378_v49 = vld [vmem:[%s2086_s6 + $0x6a8] sm:$0xff] }
  0xa1   : > { %1379 = vst [vmem:[%s2109_s21 + $0x5e0] sm:$0xff] %v867_v63  ;;  %1380 = vst [vmem:[%s2109_s21 + $0x5e8] sm:$0xff] %v868_v4  ;;  %v891_v48 = vmul.f32 %v2093_v1, %v377_v45  ;;  %v379_v50 = vld [vmem:[%s2086_s6 + $0x6b0] sm:$0xff]  ;;  %v380_v51 = vld [vmem:[%s2086_s6 + $0x6b8] sm:$0xff]  ;;  %v892_v52 = vmul.f32 %v2093_v1, %v378_v49 }
  0xa2   : > { %1381 = vst [vmem:[%s2109_s21 + $0x5f0] sm:$0xff] %v869_v5  ;;  %1382 = vst [vmem:[%s2109_s21 + $0x5f8] sm:$0xff] %v870_v6  ;;  %v893_v53 = vmul.f32 %v2093_v1, %v379_v50  ;;  %v894_v54 = vmul.f32 %v2093_v1, %v380_v51  ;;  %v381_v55 = vld [vmem:[%s2086_s6 + $0x6c0] sm:$0xff]  ;;  %v382_v56 = vld [vmem:[%s2086_s6 + $0x6c8] sm:$0xff] }
  0xa3   : > { %1383 = vst [vmem:[%s2109_s21 + $0x600] sm:$0xff] %v871_v10  ;;  %1384 = vst [vmem:[%s2109_s21 + $0x608] sm:$0xff] %v872_v11  ;;  %v383_v57 = vld [vmem:[%s2086_s6 + $0x6d0] sm:$0xff]  ;;  %v895_v58 = vmul.f32 %v2093_v1, %v381_v55  ;;  %v896_v59 = vmul.f32 %v2093_v1, %v382_v56  ;;  %v384_v61 = vld [vmem:[%s2086_s6 + $0x6d8] sm:$0xff] }
  0xa4   : > { %1385 = vst [vmem:[%s2109_s21 + $0x610] sm:$0xff] %v873_v12  ;;  %1386 = vst [vmem:[%s2109_s21 + $0x618] sm:$0xff] %v874_v16  ;;  %v897_v60 = vmul.f32 %v2093_v1, %v383_v57  ;;  %v385_v62 = vld [vmem:[%s2086_s6 + $0x6e0] sm:$0xff]  ;;  %v386_v63 = vld [vmem:[%s2086_s6 + $0x6e8] sm:$0xff]  ;;  %v898_v0 = vmul.f32 %v2093_v1, %v384_v61 }
  0xa5   : > { %1387 = vst [vmem:[%s2109_s21 + $0x620] sm:$0xff] %v875_v17  ;;  %1388 = vst [vmem:[%s2109_s21 + $0x628] sm:$0xff] %v876_v18  ;;  %v899_v2 = vmul.f32 %v2093_v1, %v385_v62  ;;  %v900_v3 = vmul.f32 %v2093_v1, %v386_v63  ;;  %v387_v4 = vld [vmem:[%s2086_s6 + $0x6f0] sm:$0xff]  ;;  %v388_v5 = vld [vmem:[%s2086_s6 + $0x6f8] sm:$0xff] }
  0xa6   : > { %1389 = vst [vmem:[%s2109_s21 + $0x630] sm:$0xff] %v877_v22  ;;  %1390 = vst [vmem:[%s2109_s21 + $0x638] sm:$0xff] %v878_v23  ;;  %v389_v6 = vld [vmem:[%s2086_s6 + $0x700] sm:$0xff]  ;;  %v901_v7 = vmul.f32 %v2093_v1, %v387_v4  ;;  %v902_v8 = vmul.f32 %v2093_v1, %v388_v5  ;;  %v390_v10 = vld [vmem:[%s2086_s6 + $0x708] sm:$0xff] }
  0xa7   : > { %1391 = vst [vmem:[%s2109_s21 + $0x640] sm:$0xff] %v879_v24  ;;  %1392 = vst [vmem:[%s2109_s21 + $0x648] sm:$0xff] %v880_v28  ;;  %v903_v9 = vmul.f32 %v2093_v1, %v389_v6  ;;  %v391_v11 = vld [vmem:[%s2086_s6 + $0x710] sm:$0xff]  ;;  %v392_v12 = vld [vmem:[%s2086_s6 + $0x718] sm:$0xff]  ;;  %v904_v13 = vmul.f32 %v2093_v1, %v390_v10 }
  0xa8   : > { %1393 = vst [vmem:[%s2109_s21 + $0x650] sm:$0xff] %v881_v29  ;;  %1394 = vst [vmem:[%s2109_s21 + $0x658] sm:$0xff] %v882_v30  ;;  %v905_v14 = vmul.f32 %v2093_v1, %v391_v11  ;;  %v906_v15 = vmul.f32 %v2093_v1, %v392_v12  ;;  %v393_v16 = vld [vmem:[%s2086_s6 + $0x720] sm:$0xff]  ;;  %v394_v17 = vld [vmem:[%s2086_s6 + $0x728] sm:$0xff] }
  0xa9   : > { %1395 = vst [vmem:[%s2109_s21 + $0x660] sm:$0xff] %v883_v34  ;;  %1396 = vst [vmem:[%s2109_s21 + $0x668] sm:$0xff] %v884_v35  ;;  %v395_v18 = vld [vmem:[%s2086_s6 + $0x730] sm:$0xff]  ;;  %v907_v19 = vmul.f32 %v2093_v1, %v393_v16  ;;  %v908_v20 = vmul.f32 %v2093_v1, %v394_v17  ;;  %v396_v22 = vld [vmem:[%s2086_s6 + $0x738] sm:$0xff] }
  0xaa   : > { %1397 = vst [vmem:[%s2109_s21 + $0x670] sm:$0xff] %v885_v36  ;;  %1398 = vst [vmem:[%s2109_s21 + $0x678] sm:$0xff] %v886_v40  ;;  %v909_v21 = vmul.f32 %v2093_v1, %v395_v18  ;;  %v397_v23 = vld [vmem:[%s2086_s6 + $0x740] sm:$0xff]  ;;  %v398_v24 = vld [vmem:[%s2086_s6 + $0x748] sm:$0xff]  ;;  %v910_v25 = vmul.f32 %v2093_v1, %v396_v22 }
  0xab   : > { %1399 = vst [vmem:[%s2109_s21 + $0x680] sm:$0xff] %v887_v41  ;;  %1400 = vst [vmem:[%s2109_s21 + $0x688] sm:$0xff] %v888_v42  ;;  %v911_v26 = vmul.f32 %v2093_v1, %v397_v23  ;;  %v912_v27 = vmul.f32 %v2093_v1, %v398_v24  ;;  %v399_v28 = vld [vmem:[%s2086_s6 + $0x750] sm:$0xff]  ;;  %v400_v29 = vld [vmem:[%s2086_s6 + $0x758] sm:$0xff] }
  0xac   : > { %1401 = vst [vmem:[%s2109_s21 + $0x690] sm:$0xff] %v889_v46  ;;  %1402 = vst [vmem:[%s2109_s21 + $0x698] sm:$0xff] %v890_v47  ;;  %v401_v30 = vld [vmem:[%s2086_s6 + $0x760] sm:$0xff]  ;;  %v913_v31 = vmul.f32 %v2093_v1, %v399_v28  ;;  %v914_v32 = vmul.f32 %v2093_v1, %v400_v29  ;;  %v402_v34 = vld [vmem:[%s2086_s6 + $0x768] sm:$0xff] }
  0xad   : > { %1403 = vst [vmem:[%s2109_s21 + $0x6a0] sm:$0xff] %v891_v48  ;;  %1404 = vst [vmem:[%s2109_s21 + $0x6a8] sm:$0xff] %v892_v52  ;;  %v915_v33 = vmul.f32 %v2093_v1, %v401_v30  ;;  %v403_v35 = vld [vmem:[%s2086_s6 + $0x770] sm:$0xff]  ;;  %v404_v36 = vld [vmem:[%s2086_s6 + $0x778] sm:$0xff]  ;;  %v916_v37 = vmul.f32 %v2093_v1, %v402_v34 }
  0xae   : > { %1405 = vst [vmem:[%s2109_s21 + $0x6b0] sm:$0xff] %v893_v53  ;;  %1406 = vst [vmem:[%s2109_s21 + $0x6b8] sm:$0xff] %v894_v54  ;;  %v917_v38 = vmul.f32 %v2093_v1, %v403_v35  ;;  %v918_v39 = vmul.f32 %v2093_v1, %v404_v36  ;;  %v405_v40 = vld [vmem:[%s2086_s6 + $0x780] sm:$0xff]  ;;  %v406_v41 = vld [vmem:[%s2086_s6 + $0x788] sm:$0xff] }
  0xaf   : > { %1407 = vst [vmem:[%s2109_s21 + $0x6c0] sm:$0xff] %v895_v58  ;;  %1408 = vst [vmem:[%s2109_s21 + $0x6c8] sm:$0xff] %v896_v59  ;;  %v407_v42 = vld [vmem:[%s2086_s6 + $0x790] sm:$0xff]  ;;  %v919_v43 = vmul.f32 %v2093_v1, %v405_v40  ;;  %v920_v44 = vmul.f32 %v2093_v1, %v406_v41  ;;  %v408_v46 = vld [vmem:[%s2086_s6 + $0x798] sm:$0xff] }
  0xb0   : > { %1409 = vst [vmem:[%s2109_s21 + $0x6d0] sm:$0xff] %v897_v60  ;;  %1410 = vst [vmem:[%s2109_s21 + $0x6d8] sm:$0xff] %v898_v0  ;;  %v921_v45 = vmul.f32 %v2093_v1, %v407_v42  ;;  %v409_v47 = vld [vmem:[%s2086_s6 + $0x7a0] sm:$0xff]  ;;  %v410_v48 = vld [vmem:[%s2086_s6 + $0x7a8] sm:$0xff]  ;;  %v922_v49 = vmul.f32 %v2093_v1, %v408_v46 }
  0xb1   : > { %1411 = vst [vmem:[%s2109_s21 + $0x6e0] sm:$0xff] %v899_v2  ;;  %1412 = vst [vmem:[%s2109_s21 + $0x6e8] sm:$0xff] %v900_v3  ;;  %v923_v50 = vmul.f32 %v2093_v1, %v409_v47  ;;  %v924_v51 = vmul.f32 %v2093_v1, %v410_v48  ;;  %v411_v52 = vld [vmem:[%s2086_s6 + $0x7b0] sm:$0xff]  ;;  %v412_v53 = vld [vmem:[%s2086_s6 + $0x7b8] sm:$0xff] }
  0xb2   : > { %1413 = vst [vmem:[%s2109_s21 + $0x6f0] sm:$0xff] %v901_v7  ;;  %1414 = vst [vmem:[%s2109_s21 + $0x6f8] sm:$0xff] %v902_v8  ;;  %v413_v54 = vld [vmem:[%s2086_s6 + $0x7c0] sm:$0xff]  ;;  %v925_v55 = vmul.f32 %v2093_v1, %v411_v52  ;;  %v926_v56 = vmul.f32 %v2093_v1, %v412_v53  ;;  %v414_v58 = vld [vmem:[%s2086_s6 + $0x7c8] sm:$0xff] }
  0xb3   : > { %1415 = vst [vmem:[%s2109_s21 + $0x700] sm:$0xff] %v903_v9  ;;  %1416 = vst [vmem:[%s2109_s21 + $0x708] sm:$0xff] %v904_v13  ;;  %v927_v57 = vmul.f32 %v2093_v1, %v413_v54  ;;  %v415_v59 = vld [vmem:[%s2086_s6 + $0x7d0] sm:$0xff]  ;;  %v416_v60 = vld [vmem:[%s2086_s6 + $0x7d8] sm:$0xff]  ;;  %v928_v61 = vmul.f32 %v2093_v1, %v414_v58 }
  0xb4   : > { %1417 = vst [vmem:[%s2109_s21 + $0x710] sm:$0xff] %v905_v14  ;;  %1418 = vst [vmem:[%s2109_s21 + $0x718] sm:$0xff] %v906_v15  ;;  %v929_v62 = vmul.f32 %v2093_v1, %v415_v59  ;;  %v930_v63 = vmul.f32 %v2093_v1, %v416_v60  ;;  %v417_v0 = vld [vmem:[%s2086_s6 + $0x7e0] sm:$0xff]  ;;  %v418_v2 = vld [vmem:[%s2086_s6 + $0x7e8] sm:$0xff] }
  0xb5   : > { %1419 = vst [vmem:[%s2109_s21 + $0x720] sm:$0xff] %v907_v19  ;;  %1420 = vst [vmem:[%s2109_s21 + $0x728] sm:$0xff] %v908_v20  ;;  %v419_v3 = vld [vmem:[%s2086_s6 + $0x7f0] sm:$0xff]  ;;  %v931_v4 = vmul.f32 %v2093_v1, %v417_v0  ;;  %v932_v5 = vmul.f32 %v2093_v1, %v418_v2  ;;  %v420_v7 = vld [vmem:[%s2086_s6 + $0x7f8] sm:$0xff] }
  0xb6   : > { %1421 = vst [vmem:[%s2109_s21 + $0x730] sm:$0xff] %v909_v21  ;;  %1422 = vst [vmem:[%s2109_s21 + $0x738] sm:$0xff] %v910_v25  ;;  %v933_v6 = vmul.f32 %v2093_v1, %v419_v3  ;;  %v421_v8 = vld [vmem:[%s2086_s6 + $0x800] sm:$0xff]  ;;  %v422_v9 = vld [vmem:[%s2086_s6 + $0x808] sm:$0xff]  ;;  %v934_v10 = vmul.f32 %v2093_v1, %v420_v7 }
  0xb7   : > { %1423 = vst [vmem:[%s2109_s21 + $0x740] sm:$0xff] %v911_v26  ;;  %1424 = vst [vmem:[%s2109_s21 + $0x748] sm:$0xff] %v912_v27  ;;  %v935_v11 = vmul.f32 %v2093_v1, %v421_v8  ;;  %v936_v12 = vmul.f32 %v2093_v1, %v422_v9  ;;  %v423_v13 = vld [vmem:[%s2086_s6 + $0x810] sm:$0xff]  ;;  %v424_v14 = vld [vmem:[%s2086_s6 + $0x818] sm:$0xff] }
  0xb8   : > { %1425 = vst [vmem:[%s2109_s21 + $0x750] sm:$0xff] %v913_v31  ;;  %1426 = vst [vmem:[%s2109_s21 + $0x758] sm:$0xff] %v914_v32  ;;  %v425_v15 = vld [vmem:[%s2086_s6 + $0x820] sm:$0xff]  ;;  %v937_v16 = vmul.f32 %v2093_v1, %v423_v13  ;;  %v938_v17 = vmul.f32 %v2093_v1, %v424_v14  ;;  %v426_v19 = vld [vmem:[%s2086_s6 + $0x828] sm:$0xff] }
  0xb9   : > { %1427 = vst [vmem:[%s2109_s21 + $0x760] sm:$0xff] %v915_v33  ;;  %1428 = vst [vmem:[%s2109_s21 + $0x768] sm:$0xff] %v916_v37  ;;  %v939_v18 = vmul.f32 %v2093_v1, %v425_v15  ;;  %v427_v20 = vld [vmem:[%s2086_s6 + $0x830] sm:$0xff]  ;;  %v428_v21 = vld [vmem:[%s2086_s6 + $0x838] sm:$0xff]  ;;  %v940_v22 = vmul.f32 %v2093_v1, %v426_v19 }
  0xba   : > { %1429 = vst [vmem:[%s2109_s21 + $0x770] sm:$0xff] %v917_v38  ;;  %1430 = vst [vmem:[%s2109_s21 + $0x778] sm:$0xff] %v918_v39  ;;  %v941_v23 = vmul.f32 %v2093_v1, %v427_v20  ;;  %v942_v24 = vmul.f32 %v2093_v1, %v428_v21  ;;  %v429_v25 = vld [vmem:[%s2086_s6 + $0x840] sm:$0xff]  ;;  %v430_v26 = vld [vmem:[%s2086_s6 + $0x848] sm:$0xff] }
  0xbb   : > { %1431 = vst [vmem:[%s2109_s21 + $0x780] sm:$0xff] %v919_v43  ;;  %1432 = vst [vmem:[%s2109_s21 + $0x788] sm:$0xff] %v920_v44  ;;  %v431_v27 = vld [vmem:[%s2086_s6 + $0x850] sm:$0xff]  ;;  %v943_v28 = vmul.f32 %v2093_v1, %v429_v25  ;;  %v944_v29 = vmul.f32 %v2093_v1, %v430_v26  ;;  %v432_v31 = vld [vmem:[%s2086_s6 + $0x858] sm:$0xff] }
  0xbc   : > { %1433 = vst [vmem:[%s2109_s21 + $0x790] sm:$0xff] %v921_v45  ;;  %1434 = vst [vmem:[%s2109_s21 + $0x798] sm:$0xff] %v922_v49  ;;  %v945_v30 = vmul.f32 %v2093_v1, %v431_v27  ;;  %v433_v32 = vld [vmem:[%s2086_s6 + $0x860] sm:$0xff]  ;;  %v434_v33 = vld [vmem:[%s2086_s6 + $0x868] sm:$0xff]  ;;  %v946_v34 = vmul.f32 %v2093_v1, %v432_v31 }
  0xbd   : > { %1435 = vst [vmem:[%s2109_s21 + $0x7a0] sm:$0xff] %v923_v50  ;;  %1436 = vst [vmem:[%s2109_s21 + $0x7a8] sm:$0xff] %v924_v51  ;;  %v947_v35 = vmul.f32 %v2093_v1, %v433_v32  ;;  %v948_v36 = vmul.f32 %v2093_v1, %v434_v33  ;;  %v435_v37 = vld [vmem:[%s2086_s6 + $0x870] sm:$0xff]  ;;  %v436_v38 = vld [vmem:[%s2086_s6 + $0x878] sm:$0xff] }
  0xbe   : > { %1437 = vst [vmem:[%s2109_s21 + $0x7b0] sm:$0xff] %v925_v55  ;;  %1438 = vst [vmem:[%s2109_s21 + $0x7b8] sm:$0xff] %v926_v56  ;;  %v437_v39 = vld [vmem:[%s2086_s6 + $0x880] sm:$0xff]  ;;  %v949_v40 = vmul.f32 %v2093_v1, %v435_v37  ;;  %v950_v41 = vmul.f32 %v2093_v1, %v436_v38  ;;  %v438_v43 = vld [vmem:[%s2086_s6 + $0x888] sm:$0xff] }
  0xbf   : > { %1439 = vst [vmem:[%s2109_s21 + $0x7c0] sm:$0xff] %v927_v57  ;;  %1440 = vst [vmem:[%s2109_s21 + $0x7c8] sm:$0xff] %v928_v61  ;;  %v951_v42 = vmul.f32 %v2093_v1, %v437_v39  ;;  %v439_v44 = vld [vmem:[%s2086_s6 + $0x890] sm:$0xff]  ;;  %v440_v45 = vld [vmem:[%s2086_s6 + $0x898] sm:$0xff]  ;;  %v952_v46 = vmul.f32 %v2093_v1, %v438_v43 }
  0xc0   : > { %1441 = vst [vmem:[%s2109_s21 + $0x7d0] sm:$0xff] %v929_v62  ;;  %1442 = vst [vmem:[%s2109_s21 + $0x7d8] sm:$0xff] %v930_v63  ;;  %v953_v47 = vmul.f32 %v2093_v1, %v439_v44  ;;  %v954_v48 = vmul.f32 %v2093_v1, %v440_v45  ;;  %v441_v49 = vld [vmem:[%s2086_s6 + $0x8a0] sm:$0xff]  ;;  %v442_v50 = vld [vmem:[%s2086_s6 + $0x8a8] sm:$0xff] }
  0xc1   : > { %1443 = vst [vmem:[%s2109_s21 + $0x7e0] sm:$0xff] %v931_v4  ;;  %1444 = vst [vmem:[%s2109_s21 + $0x7e8] sm:$0xff] %v932_v5  ;;  %v443_v51 = vld [vmem:[%s2086_s6 + $0x8b0] sm:$0xff]  ;;  %v955_v52 = vmul.f32 %v2093_v1, %v441_v49  ;;  %v956_v53 = vmul.f32 %v2093_v1, %v442_v50  ;;  %v444_v55 = vld [vmem:[%s2086_s6 + $0x8b8] sm:$0xff] }
  0xc2   : > { %1445 = vst [vmem:[%s2109_s21 + $0x7f0] sm:$0xff] %v933_v6  ;;  %1446 = vst [vmem:[%s2109_s21 + $0x7f8] sm:$0xff] %v934_v10  ;;  %v957_v54 = vmul.f32 %v2093_v1, %v443_v51  ;;  %v445_v56 = vld [vmem:[%s2086_s6 + $0x8c0] sm:$0xff]  ;;  %v446_v57 = vld [vmem:[%s2086_s6 + $0x8c8] sm:$0xff]  ;;  %v958_v58 = vmul.f32 %v2093_v1, %v444_v55 }
  0xc3   : > { %1447 = vst [vmem:[%s2109_s21 + $0x800] sm:$0xff] %v935_v11  ;;  %1448 = vst [vmem:[%s2109_s21 + $0x808] sm:$0xff] %v936_v12  ;;  %v959_v59 = vmul.f32 %v2093_v1, %v445_v56  ;;  %v960_v60 = vmul.f32 %v2093_v1, %v446_v57  ;;  %v447_v61 = vld [vmem:[%s2086_s6 + $0x8d0] sm:$0xff]  ;;  %v448_v62 = vld [vmem:[%s2086_s6 + $0x8d8] sm:$0xff] }
  0xc4   : > { %1449 = vst [vmem:[%s2109_s21 + $0x810] sm:$0xff] %v937_v16  ;;  %1450 = vst [vmem:[%s2109_s21 + $0x818] sm:$0xff] %v938_v17  ;;  %v449_v63 = vld [vmem:[%s2086_s6 + $0x8e0] sm:$0xff]  ;;  %v961_v0 = vmul.f32 %v2093_v1, %v447_v61  ;;  %v962_v2 = vmul.f32 %v2093_v1, %v448_v62  ;;  %v450_v4 = vld [vmem:[%s2086_s6 + $0x8e8] sm:$0xff] }
  0xc5   : > { %1451 = vst [vmem:[%s2109_s21 + $0x820] sm:$0xff] %v939_v18  ;;  %1452 = vst [vmem:[%s2109_s21 + $0x828] sm:$0xff] %v940_v22  ;;  %v963_v3 = vmul.f32 %v2093_v1, %v449_v63  ;;  %v451_v5 = vld [vmem:[%s2086_s6 + $0x8f0] sm:$0xff]  ;;  %v452_v6 = vld [vmem:[%s2086_s6 + $0x8f8] sm:$0xff]  ;;  %v964_v7 = vmul.f32 %v2093_v1, %v450_v4 }
  0xc6   : > { %1453 = vst [vmem:[%s2109_s21 + $0x830] sm:$0xff] %v941_v23  ;;  %1454 = vst [vmem:[%s2109_s21 + $0x838] sm:$0xff] %v942_v24  ;;  %v965_v8 = vmul.f32 %v2093_v1, %v451_v5  ;;  %v966_v9 = vmul.f32 %v2093_v1, %v452_v6  ;;  %v453_v10 = vld [vmem:[%s2086_s6 + $0x900] sm:$0xff]  ;;  %v454_v11 = vld [vmem:[%s2086_s6 + $0x908] sm:$0xff] }
  0xc7   : > { %1455 = vst [vmem:[%s2109_s21 + $0x840] sm:$0xff] %v943_v28  ;;  %1456 = vst [vmem:[%s2109_s21 + $0x848] sm:$0xff] %v944_v29  ;;  %v455_v12 = vld [vmem:[%s2086_s6 + $0x910] sm:$0xff]  ;;  %v967_v13 = vmul.f32 %v2093_v1, %v453_v10  ;;  %v968_v14 = vmul.f32 %v2093_v1, %v454_v11  ;;  %v456_v16 = vld [vmem:[%s2086_s6 + $0x918] sm:$0xff] }
  0xc8   : > { %1457 = vst [vmem:[%s2109_s21 + $0x850] sm:$0xff] %v945_v30  ;;  %1458 = vst [vmem:[%s2109_s21 + $0x858] sm:$0xff] %v946_v34  ;;  %v969_v15 = vmul.f32 %v2093_v1, %v455_v12  ;;  %v457_v17 = vld [vmem:[%s2086_s6 + $0x920] sm:$0xff]  ;;  %v458_v18 = vld [vmem:[%s2086_s6 + $0x928] sm:$0xff]  ;;  %v970_v19 = vmul.f32 %v2093_v1, %v456_v16 }
  0xc9   : > { %1459 = vst [vmem:[%s2109_s21 + $0x860] sm:$0xff] %v947_v35  ;;  %1460 = vst [vmem:[%s2109_s21 + $0x868] sm:$0xff] %v948_v36  ;;  %v971_v20 = vmul.f32 %v2093_v1, %v457_v17  ;;  %v972_v21 = vmul.f32 %v2093_v1, %v458_v18  ;;  %v459_v22 = vld [vmem:[%s2086_s6 + $0x930] sm:$0xff]  ;;  %v460_v23 = vld [vmem:[%s2086_s6 + $0x938] sm:$0xff] }
  0xca   : > { %1461 = vst [vmem:[%s2109_s21 + $0x870] sm:$0xff] %v949_v40  ;;  %1462 = vst [vmem:[%s2109_s21 + $0x878] sm:$0xff] %v950_v41  ;;  %v461_v24 = vld [vmem:[%s2086_s6 + $0x940] sm:$0xff]  ;;  %v973_v25 = vmul.f32 %v2093_v1, %v459_v22  ;;  %v974_v26 = vmul.f32 %v2093_v1, %v460_v23  ;;  %v462_v28 = vld [vmem:[%s2086_s6 + $0x948] sm:$0xff] }
  0xcb   : > { %1463 = vst [vmem:[%s2109_s21 + $0x880] sm:$0xff] %v951_v42  ;;  %1464 = vst [vmem:[%s2109_s21 + $0x888] sm:$0xff] %v952_v46  ;;  %v975_v27 = vmul.f32 %v2093_v1, %v461_v24  ;;  %v463_v29 = vld [vmem:[%s2086_s6 + $0x950] sm:$0xff]  ;;  %v464_v30 = vld [vmem:[%s2086_s6 + $0x958] sm:$0xff]  ;;  %v976_v31 = vmul.f32 %v2093_v1, %v462_v28 }
  0xcc   : > { %1465 = vst [vmem:[%s2109_s21 + $0x890] sm:$0xff] %v953_v47  ;;  %1466 = vst [vmem:[%s2109_s21 + $0x898] sm:$0xff] %v954_v48  ;;  %v977_v32 = vmul.f32 %v2093_v1, %v463_v29  ;;  %v978_v33 = vmul.f32 %v2093_v1, %v464_v30  ;;  %v465_v34 = vld [vmem:[%s2086_s6 + $0x960] sm:$0xff]  ;;  %v466_v35 = vld [vmem:[%s2086_s6 + $0x968] sm:$0xff] }
  0xcd   : > { %1467 = vst [vmem:[%s2109_s21 + $0x8a0] sm:$0xff] %v955_v52  ;;  %1468 = vst [vmem:[%s2109_s21 + $0x8a8] sm:$0xff] %v956_v53  ;;  %v467_v36 = vld [vmem:[%s2086_s6 + $0x970] sm:$0xff]  ;;  %v979_v37 = vmul.f32 %v2093_v1, %v465_v34  ;;  %v980_v38 = vmul.f32 %v2093_v1, %v466_v35  ;;  %v468_v40 = vld [vmem:[%s2086_s6 + $0x978] sm:$0xff] }
  0xce   : > { %1469 = vst [vmem:[%s2109_s21 + $0x8b0] sm:$0xff] %v957_v54  ;;  %1470 = vst [vmem:[%s2109_s21 + $0x8b8] sm:$0xff] %v958_v58  ;;  %v981_v39 = vmul.f32 %v2093_v1, %v467_v36  ;;  %v469_v41 = vld [vmem:[%s2086_s6 + $0x980] sm:$0xff]  ;;  %v470_v42 = vld [vmem:[%s2086_s6 + $0x988] sm:$0xff]  ;;  %v982_v43 = vmul.f32 %v2093_v1, %v468_v40 }
  0xcf   : > { %1471 = vst [vmem:[%s2109_s21 + $0x8c0] sm:$0xff] %v959_v59  ;;  %1472 = vst [vmem:[%s2109_s21 + $0x8c8] sm:$0xff] %v960_v60  ;;  %v983_v44 = vmul.f32 %v2093_v1, %v469_v41  ;;  %v984_v45 = vmul.f32 %v2093_v1, %v470_v42  ;;  %v471_v46 = vld [vmem:[%s2086_s6 + $0x990] sm:$0xff]  ;;  %v472_v47 = vld [vmem:[%s2086_s6 + $0x998] sm:$0xff] }
  0xd0   : > { %1473 = vst [vmem:[%s2109_s21 + $0x8d0] sm:$0xff] %v961_v0  ;;  %1474 = vst [vmem:[%s2109_s21 + $0x8d8] sm:$0xff] %v962_v2  ;;  %v473_v48 = vld [vmem:[%s2086_s6 + $0x9a0] sm:$0xff]  ;;  %v985_v49 = vmul.f32 %v2093_v1, %v471_v46  ;;  %v986_v50 = vmul.f32 %v2093_v1, %v472_v47  ;;  %v474_v52 = vld [vmem:[%s2086_s6 + $0x9a8] sm:$0xff] }
  0xd1   : > { %1475 = vst [vmem:[%s2109_s21 + $0x8e0] sm:$0xff] %v963_v3  ;;  %1476 = vst [vmem:[%s2109_s21 + $0x8e8] sm:$0xff] %v964_v7  ;;  %v987_v51 = vmul.f32 %v2093_v1, %v473_v48  ;;  %v475_v53 = vld [vmem:[%s2086_s6 + $0x9b0] sm:$0xff]  ;;  %v476_v54 = vld [vmem:[%s2086_s6 + $0x9b8] sm:$0xff]  ;;  %v988_v55 = vmul.f32 %v2093_v1, %v474_v52 }
  0xd2   : > { %1477 = vst [vmem:[%s2109_s21 + $0x8f0] sm:$0xff] %v965_v8  ;;  %1478 = vst [vmem:[%s2109_s21 + $0x8f8] sm:$0xff] %v966_v9  ;;  %v989_v56 = vmul.f32 %v2093_v1, %v475_v53  ;;  %v990_v57 = vmul.f32 %v2093_v1, %v476_v54  ;;  %v477_v58 = vld [vmem:[%s2086_s6 + $0x9c0] sm:$0xff]  ;;  %v478_v59 = vld [vmem:[%s2086_s6 + $0x9c8] sm:$0xff] }
  0xd3   : > { %1479 = vst [vmem:[%s2109_s21 + $0x900] sm:$0xff] %v967_v13  ;;  %1480 = vst [vmem:[%s2109_s21 + $0x908] sm:$0xff] %v968_v14  ;;  %v479_v60 = vld [vmem:[%s2086_s6 + $0x9d0] sm:$0xff]  ;;  %v991_v61 = vmul.f32 %v2093_v1, %v477_v58  ;;  %v992_v62 = vmul.f32 %v2093_v1, %v478_v59  ;;  %v480_v0 = vld [vmem:[%s2086_s6 + $0x9d8] sm:$0xff] }
  0xd4   : > { %1481 = vst [vmem:[%s2109_s21 + $0x910] sm:$0xff] %v969_v15  ;;  %1482 = vst [vmem:[%s2109_s21 + $0x918] sm:$0xff] %v970_v19  ;;  %v993_v63 = vmul.f32 %v2093_v1, %v479_v60  ;;  %v481_v2 = vld [vmem:[%s2086_s6 + $0x9e0] sm:$0xff]  ;;  %v482_v3 = vld [vmem:[%s2086_s6 + $0x9e8] sm:$0xff]  ;;  %v994_v4 = vmul.f32 %v2093_v1, %v480_v0 }
  0xd5   : > { %1483 = vst [vmem:[%s2109_s21 + $0x920] sm:$0xff] %v971_v20  ;;  %1484 = vst [vmem:[%s2109_s21 + $0x928] sm:$0xff] %v972_v21  ;;  %v995_v5 = vmul.f32 %v2093_v1, %v481_v2  ;;  %v996_v6 = vmul.f32 %v2093_v1, %v482_v3  ;;  %v483_v7 = vld [vmem:[%s2086_s6 + $0x9f0] sm:$0xff]  ;;  %v484_v8 = vld [vmem:[%s2086_s6 + $0x9f8] sm:$0xff] }
  0xd6   : > { %1485 = vst [vmem:[%s2109_s21 + $0x930] sm:$0xff] %v973_v25  ;;  %1486 = vst [vmem:[%s2109_s21 + $0x938] sm:$0xff] %v974_v26  ;;  %v485_v9 = vld [vmem:[%s2086_s6 + $0xa00] sm:$0xff]  ;;  %v997_v10 = vmul.f32 %v2093_v1, %v483_v7  ;;  %v998_v11 = vmul.f32 %v2093_v1, %v484_v8  ;;  %v486_v13 = vld [vmem:[%s2086_s6 + $0xa08] sm:$0xff] }
  0xd7   : > { %1487 = vst [vmem:[%s2109_s21 + $0x940] sm:$0xff] %v975_v27  ;;  %1488 = vst [vmem:[%s2109_s21 + $0x948] sm:$0xff] %v976_v31  ;;  %v999_v12 = vmul.f32 %v2093_v1, %v485_v9  ;;  %v487_v14 = vld [vmem:[%s2086_s6 + $0xa10] sm:$0xff]  ;;  %v488_v15 = vld [vmem:[%s2086_s6 + $0xa18] sm:$0xff]  ;;  %v1000_v16 = vmul.f32 %v2093_v1, %v486_v13 }
  0xd8   : > { %1489 = vst [vmem:[%s2109_s21 + $0x950] sm:$0xff] %v977_v32  ;;  %1490 = vst [vmem:[%s2109_s21 + $0x958] sm:$0xff] %v978_v33  ;;  %v1001_v17 = vmul.f32 %v2093_v1, %v487_v14  ;;  %v1002_v18 = vmul.f32 %v2093_v1, %v488_v15  ;;  %v489_v19 = vld [vmem:[%s2086_s6 + $0xa20] sm:$0xff]  ;;  %v490_v20 = vld [vmem:[%s2086_s6 + $0xa28] sm:$0xff] }
  0xd9   : > { %1491 = vst [vmem:[%s2109_s21 + $0x960] sm:$0xff] %v979_v37  ;;  %1492 = vst [vmem:[%s2109_s21 + $0x968] sm:$0xff] %v980_v38  ;;  %v491_v21 = vld [vmem:[%s2086_s6 + $0xa30] sm:$0xff]  ;;  %v1003_v22 = vmul.f32 %v2093_v1, %v489_v19  ;;  %v1004_v23 = vmul.f32 %v2093_v1, %v490_v20  ;;  %v492_v25 = vld [vmem:[%s2086_s6 + $0xa38] sm:$0xff] }
  0xda   : > { %1493 = vst [vmem:[%s2109_s21 + $0x970] sm:$0xff] %v981_v39  ;;  %1494 = vst [vmem:[%s2109_s21 + $0x978] sm:$0xff] %v982_v43  ;;  %v1005_v24 = vmul.f32 %v2093_v1, %v491_v21  ;;  %v493_v26 = vld [vmem:[%s2086_s6 + $0xa40] sm:$0xff]  ;;  %v494_v27 = vld [vmem:[%s2086_s6 + $0xa48] sm:$0xff]  ;;  %v1006_v28 = vmul.f32 %v2093_v1, %v492_v25 }
  0xdb   : > { %1495 = vst [vmem:[%s2109_s21 + $0x980] sm:$0xff] %v983_v44  ;;  %1496 = vst [vmem:[%s2109_s21 + $0x988] sm:$0xff] %v984_v45  ;;  %v1007_v29 = vmul.f32 %v2093_v1, %v493_v26  ;;  %v1008_v30 = vmul.f32 %v2093_v1, %v494_v27  ;;  %v495_v31 = vld [vmem:[%s2086_s6 + $0xa50] sm:$0xff]  ;;  %v496_v32 = vld [vmem:[%s2086_s6 + $0xa58] sm:$0xff] }
  0xdc   : > { %1497 = vst [vmem:[%s2109_s21 + $0x990] sm:$0xff] %v985_v49  ;;  %1498 = vst [vmem:[%s2109_s21 + $0x998] sm:$0xff] %v986_v50  ;;  %v497_v33 = vld [vmem:[%s2086_s6 + $0xa60] sm:$0xff]  ;;  %v1009_v34 = vmul.f32 %v2093_v1, %v495_v31  ;;  %v1010_v35 = vmul.f32 %v2093_v1, %v496_v32  ;;  %v498_v37 = vld [vmem:[%s2086_s6 + $0xa68] sm:$0xff] }
  0xdd   : > { %1499 = vst [vmem:[%s2109_s21 + $0x9a0] sm:$0xff] %v987_v51  ;;  %1500 = vst [vmem:[%s2109_s21 + $0x9a8] sm:$0xff] %v988_v55  ;;  %v1011_v36 = vmul.f32 %v2093_v1, %v497_v33  ;;  %v499_v38 = vld [vmem:[%s2086_s6 + $0xa70] sm:$0xff]  ;;  %v500_v39 = vld [vmem:[%s2086_s6 + $0xa78] sm:$0xff]  ;;  %v1012_v40 = vmul.f32 %v2093_v1, %v498_v37 }
  0xde   : > { %1501 = vst [vmem:[%s2109_s21 + $0x9b0] sm:$0xff] %v989_v56  ;;  %1502 = vst [vmem:[%s2109_s21 + $0x9b8] sm:$0xff] %v990_v57  ;;  %v1013_v41 = vmul.f32 %v2093_v1, %v499_v38  ;;  %v1014_v42 = vmul.f32 %v2093_v1, %v500_v39  ;;  %v501_v43 = vld [vmem:[%s2086_s6 + $0xa80] sm:$0xff]  ;;  %v502_v44 = vld [vmem:[%s2086_s6 + $0xa88] sm:$0xff] }
  0xdf   : > { %1503 = vst [vmem:[%s2109_s21 + $0x9c0] sm:$0xff] %v991_v61  ;;  %1504 = vst [vmem:[%s2109_s21 + $0x9c8] sm:$0xff] %v992_v62  ;;  %v503_v45 = vld [vmem:[%s2086_s6 + $0xa90] sm:$0xff]  ;;  %v1015_v46 = vmul.f32 %v2093_v1, %v501_v43  ;;  %v1016_v47 = vmul.f32 %v2093_v1, %v502_v44  ;;  %v504_v49 = vld [vmem:[%s2086_s6 + $0xa98] sm:$0xff] }
  0xe0   : > { %1505 = vst [vmem:[%s2109_s21 + $0x9d0] sm:$0xff] %v993_v63  ;;  %1506 = vst [vmem:[%s2109_s21 + $0x9d8] sm:$0xff] %v994_v4  ;;  %v1017_v48 = vmul.f32 %v2093_v1, %v503_v45  ;;  %v505_v50 = vld [vmem:[%s2086_s6 + $0xaa0] sm:$0xff]  ;;  %v506_v51 = vld [vmem:[%s2086_s6 + $0xaa8] sm:$0xff]  ;;  %v1018_v52 = vmul.f32 %v2093_v1, %v504_v49 }
  0xe1   : > { %1507 = vst [vmem:[%s2109_s21 + $0x9e0] sm:$0xff] %v995_v5  ;;  %1508 = vst [vmem:[%s2109_s21 + $0x9e8] sm:$0xff] %v996_v6  ;;  %v1019_v53 = vmul.f32 %v2093_v1, %v505_v50  ;;  %v1020_v54 = vmul.f32 %v2093_v1, %v506_v51  ;;  %v507_v55 = vld [vmem:[%s2086_s6 + $0xab0] sm:$0xff]  ;;  %v508_v56 = vld [vmem:[%s2086_s6 + $0xab8] sm:$0xff] }
  0xe2   : > { %1509 = vst [vmem:[%s2109_s21 + $0x9f0] sm:$0xff] %v997_v10  ;;  %1510 = vst [vmem:[%s2109_s21 + $0x9f8] sm:$0xff] %v998_v11  ;;  %v509_v57 = vld [vmem:[%s2086_s6 + $0xac0] sm:$0xff]  ;;  %v1021_v58 = vmul.f32 %v2093_v1, %v507_v55  ;;  %v1022_v59 = vmul.f32 %v2093_v1, %v508_v56  ;;  %v510_v61 = vld [vmem:[%s2086_s6 + $0xac8] sm:$0xff] }
  0xe3   : > { %1511 = vst [vmem:[%s2109_s21 + $0xa00] sm:$0xff] %v999_v12  ;;  %1512 = vst [vmem:[%s2109_s21 + $0xa08] sm:$0xff] %v1000_v16  ;;  %v1023_v60 = vmul.f32 %v2093_v1, %v509_v57  ;;  %v511_v62 = vld [vmem:[%s2086_s6 + $0xad0] sm:$0xff]  ;;  %v512_v63 = vld [vmem:[%s2086_s6 + $0xad8] sm:$0xff]  ;;  %v1024_v0 = vmul.f32 %v2093_v1, %v510_v61 }
  0xe4   : > { %1513 = vst [vmem:[%s2109_s21 + $0xa10] sm:$0xff] %v1001_v17  ;;  %1514 = vst [vmem:[%s2109_s21 + $0xa18] sm:$0xff] %v1002_v18  ;;  %v1025_v2 = vmul.f32 %v2093_v1, %v511_v62  ;;  %v1026_v3 = vmul.f32 %v2093_v1, %v512_v63  ;;  %v513_v4 = vld [vmem:[%s2086_s6 + $0xae0] sm:$0xff]  ;;  %v514_v5 = vld [vmem:[%s2086_s6 + $0xae8] sm:$0xff] }
  0xe5   : > { %1515 = vst [vmem:[%s2109_s21 + $0xa20] sm:$0xff] %v1003_v22  ;;  %1516 = vst [vmem:[%s2109_s21 + $0xa28] sm:$0xff] %v1004_v23  ;;  %v515_v6 = vld [vmem:[%s2086_s6 + $0xaf0] sm:$0xff]  ;;  %v1027_v7 = vmul.f32 %v2093_v1, %v513_v4  ;;  %v1028_v8 = vmul.f32 %v2093_v1, %v514_v5  ;;  %v516_v10 = vld [vmem:[%s2086_s6 + $0xaf8] sm:$0xff] }
  0xe6   : > { %1517 = vst [vmem:[%s2109_s21 + $0xa30] sm:$0xff] %v1005_v24  ;;  %1518 = vst [vmem:[%s2109_s21 + $0xa38] sm:$0xff] %v1006_v28  ;;  %v1029_v9 = vmul.f32 %v2093_v1, %v515_v6  ;;  %v517_v11 = vld [vmem:[%s2086_s6 + $0xb00] sm:$0xff]  ;;  %v518_v12 = vld [vmem:[%s2086_s6 + $0xb08] sm:$0xff]  ;;  %v1030_v13 = vmul.f32 %v2093_v1, %v516_v10 }
  0xe7   : > { %1519 = vst [vmem:[%s2109_s21 + $0xa40] sm:$0xff] %v1007_v29  ;;  %1520 = vst [vmem:[%s2109_s21 + $0xa48] sm:$0xff] %v1008_v30  ;;  %v1031_v14 = vmul.f32 %v2093_v1, %v517_v11  ;;  %v1032_v15 = vmul.f32 %v2093_v1, %v518_v12  ;;  %v519_v16 = vld [vmem:[%s2086_s6 + $0xb10] sm:$0xff]  ;;  %v520_v17 = vld [vmem:[%s2086_s6 + $0xb18] sm:$0xff] }
  0xe8   : > { %1521 = vst [vmem:[%s2109_s21 + $0xa50] sm:$0xff] %v1009_v34  ;;  %1522 = vst [vmem:[%s2109_s21 + $0xa58] sm:$0xff] %v1010_v35  ;;  %v521_v18 = vld [vmem:[%s2086_s6 + $0xb20] sm:$0xff]  ;;  %v1033_v19 = vmul.f32 %v2093_v1, %v519_v16  ;;  %v1034_v20 = vmul.f32 %v2093_v1, %v520_v17  ;;  %v522_v22 = vld [vmem:[%s2086_s6 + $0xb28] sm:$0xff] }
  0xe9   : > { %1523 = vst [vmem:[%s2109_s21 + $0xa60] sm:$0xff] %v1011_v36  ;;  %1524 = vst [vmem:[%s2109_s21 + $0xa68] sm:$0xff] %v1012_v40  ;;  %v1035_v21 = vmul.f32 %v2093_v1, %v521_v18  ;;  %v523_v23 = vld [vmem:[%s2086_s6 + $0xb30] sm:$0xff]  ;;  %v524_v24 = vld [vmem:[%s2086_s6 + $0xb38] sm:$0xff]  ;;  %v1036_v25 = vmul.f32 %v2093_v1, %v522_v22 }
  0xea   : > { %1525 = vst [vmem:[%s2109_s21 + $0xa70] sm:$0xff] %v1013_v41  ;;  %1526 = vst [vmem:[%s2109_s21 + $0xa78] sm:$0xff] %v1014_v42  ;;  %v1037_v26 = vmul.f32 %v2093_v1, %v523_v23  ;;  %v1038_v27 = vmul.f32 %v2093_v1, %v524_v24  ;;  %v525_v28 = vld [vmem:[%s2086_s6 + $0xb40] sm:$0xff]  ;;  %v526_v29 = vld [vmem:[%s2086_s6 + $0xb48] sm:$0xff] }
  0xeb   : > { %1527 = vst [vmem:[%s2109_s21 + $0xa80] sm:$0xff] %v1015_v46  ;;  %1528 = vst [vmem:[%s2109_s21 + $0xa88] sm:$0xff] %v1016_v47  ;;  %v527_v30 = vld [vmem:[%s2086_s6 + $0xb50] sm:$0xff]  ;;  %v1039_v31 = vmul.f32 %v2093_v1, %v525_v28  ;;  %v1040_v32 = vmul.f32 %v2093_v1, %v526_v29  ;;  %v528_v34 = vld [vmem:[%s2086_s6 + $0xb58] sm:$0xff] }
  0xec   : > { %1529 = vst [vmem:[%s2109_s21 + $0xa90] sm:$0xff] %v1017_v48  ;;  %1530 = vst [vmem:[%s2109_s21 + $0xa98] sm:$0xff] %v1018_v52  ;;  %v1041_v33 = vmul.f32 %v2093_v1, %v527_v30  ;;  %v529_v35 = vld [vmem:[%s2086_s6 + $0xb60] sm:$0xff]  ;;  %v530_v36 = vld [vmem:[%s2086_s6 + $0xb68] sm:$0xff]  ;;  %v1042_v37 = vmul.f32 %v2093_v1, %v528_v34 }
  0xed   : > { %1531 = vst [vmem:[%s2109_s21 + $0xaa0] sm:$0xff] %v1019_v53  ;;  %1532 = vst [vmem:[%s2109_s21 + $0xaa8] sm:$0xff] %v1020_v54  ;;  %v1043_v38 = vmul.f32 %v2093_v1, %v529_v35  ;;  %v1044_v39 = vmul.f32 %v2093_v1, %v530_v36  ;;  %v531_v40 = vld [vmem:[%s2086_s6 + $0xb70] sm:$0xff]  ;;  %v532_v41 = vld [vmem:[%s2086_s6 + $0xb78] sm:$0xff] }
  0xee   : > { %1533 = vst [vmem:[%s2109_s21 + $0xab0] sm:$0xff] %v1021_v58  ;;  %1534 = vst [vmem:[%s2109_s21 + $0xab8] sm:$0xff] %v1022_v59  ;;  %v533_v42 = vld [vmem:[%s2086_s6 + $0xb80] sm:$0xff]  ;;  %v1045_v43 = vmul.f32 %v2093_v1, %v531_v40  ;;  %v1046_v44 = vmul.f32 %v2093_v1, %v532_v41  ;;  %v534_v46 = vld [vmem:[%s2086_s6 + $0xb88] sm:$0xff] }
  0xef   : > { %1535 = vst [vmem:[%s2109_s21 + $0xac0] sm:$0xff] %v1023_v60  ;;  %1536 = vst [vmem:[%s2109_s21 + $0xac8] sm:$0xff] %v1024_v0  ;;  %v1047_v45 = vmul.f32 %v2093_v1, %v533_v42  ;;  %v535_v47 = vld [vmem:[%s2086_s6 + $0xb90] sm:$0xff]  ;;  %v536_v48 = vld [vmem:[%s2086_s6 + $0xb98] sm:$0xff]  ;;  %v1048_v49 = vmul.f32 %v2093_v1, %v534_v46 }
  0xf0   : > { %1537 = vst [vmem:[%s2109_s21 + $0xad0] sm:$0xff] %v1025_v2  ;;  %1538 = vst [vmem:[%s2109_s21 + $0xad8] sm:$0xff] %v1026_v3  ;;  %v1049_v50 = vmul.f32 %v2093_v1, %v535_v47  ;;  %v1050_v51 = vmul.f32 %v2093_v1, %v536_v48  ;;  %v537_v52 = vld [vmem:[%s2086_s6 + $0xba0] sm:$0xff]  ;;  %v538_v53 = vld [vmem:[%s2086_s6 + $0xba8] sm:$0xff] }
  0xf1   : > { %1539 = vst [vmem:[%s2109_s21 + $0xae0] sm:$0xff] %v1027_v7  ;;  %1540 = vst [vmem:[%s2109_s21 + $0xae8] sm:$0xff] %v1028_v8  ;;  %v539_v54 = vld [vmem:[%s2086_s6 + $0xbb0] sm:$0xff]  ;;  %v1051_v55 = vmul.f32 %v2093_v1, %v537_v52  ;;  %v1052_v56 = vmul.f32 %v2093_v1, %v538_v53  ;;  %v540_v58 = vld [vmem:[%s2086_s6 + $0xbb8] sm:$0xff] }
  0xf2   : > { %1541 = vst [vmem:[%s2109_s21 + $0xaf0] sm:$0xff] %v1029_v9  ;;  %1542 = vst [vmem:[%s2109_s21 + $0xaf8] sm:$0xff] %v1030_v13  ;;  %v1053_v57 = vmul.f32 %v2093_v1, %v539_v54  ;;  %v541_v59 = vld [vmem:[%s2086_s6 + $0xbc0] sm:$0xff]  ;;  %v542_v60 = vld [vmem:[%s2086_s6 + $0xbc8] sm:$0xff]  ;;  %v1054_v61 = vmul.f32 %v2093_v1, %v540_v58 }
  0xf3   : > { %1543 = vst [vmem:[%s2109_s21 + $0xb00] sm:$0xff] %v1031_v14  ;;  %1544 = vst [vmem:[%s2109_s21 + $0xb08] sm:$0xff] %v1032_v15  ;;  %v1055_v62 = vmul.f32 %v2093_v1, %v541_v59  ;;  %v1056_v63 = vmul.f32 %v2093_v1, %v542_v60  ;;  %v543_v0 = vld [vmem:[%s2086_s6 + $0xbd0] sm:$0xff]  ;;  %v544_v2 = vld [vmem:[%s2086_s6 + $0xbd8] sm:$0xff] }
  0xf4   : > { %1545 = vst [vmem:[%s2109_s21 + $0xb10] sm:$0xff] %v1033_v19  ;;  %1546 = vst [vmem:[%s2109_s21 + $0xb18] sm:$0xff] %v1034_v20  ;;  %v545_v3 = vld [vmem:[%s2086_s6 + $0xbe0] sm:$0xff]  ;;  %v1057_v4 = vmul.f32 %v2093_v1, %v543_v0  ;;  %v1058_v5 = vmul.f32 %v2093_v1, %v544_v2  ;;  %v546_v7 = vld [vmem:[%s2086_s6 + $0xbe8] sm:$0xff] }
  0xf5   : > { %1547 = vst [vmem:[%s2109_s21 + $0xb20] sm:$0xff] %v1035_v21  ;;  %1548 = vst [vmem:[%s2109_s21 + $0xb28] sm:$0xff] %v1036_v25  ;;  %v1059_v6 = vmul.f32 %v2093_v1, %v545_v3  ;;  %v547_v8 = vld [vmem:[%s2086_s6 + $0xbf0] sm:$0xff]  ;;  %v548_v9 = vld [vmem:[%s2086_s6 + $0xbf8] sm:$0xff]  ;;  %v1060_v10 = vmul.f32 %v2093_v1, %v546_v7 }
  0xf6   : > { %1549 = vst [vmem:[%s2109_s21 + $0xb30] sm:$0xff] %v1037_v26  ;;  %1550 = vst [vmem:[%s2109_s21 + $0xb38] sm:$0xff] %v1038_v27  ;;  %v1061_v11 = vmul.f32 %v2093_v1, %v547_v8  ;;  %v1062_v12 = vmul.f32 %v2093_v1, %v548_v9  ;;  %v549_v13 = vld [vmem:[%s2086_s6 + $0xc00] sm:$0xff]  ;;  %v550_v14 = vld [vmem:[%s2086_s6 + $0xc08] sm:$0xff] }
  0xf7   : > { %1551 = vst [vmem:[%s2109_s21 + $0xb40] sm:$0xff] %v1039_v31  ;;  %1552 = vst [vmem:[%s2109_s21 + $0xb48] sm:$0xff] %v1040_v32  ;;  %v551_v15 = vld [vmem:[%s2086_s6 + $0xc10] sm:$0xff]  ;;  %v1063_v16 = vmul.f32 %v2093_v1, %v549_v13  ;;  %v1064_v17 = vmul.f32 %v2093_v1, %v550_v14  ;;  %v552_v19 = vld [vmem:[%s2086_s6 + $0xc18] sm:$0xff] }
  0xf8   : > { %1553 = vst [vmem:[%s2109_s21 + $0xb50] sm:$0xff] %v1041_v33  ;;  %1554 = vst [vmem:[%s2109_s21 + $0xb58] sm:$0xff] %v1042_v37  ;;  %v1065_v18 = vmul.f32 %v2093_v1, %v551_v15  ;;  %v553_v20 = vld [vmem:[%s2086_s6 + $0xc20] sm:$0xff]  ;;  %v554_v21 = vld [vmem:[%s2086_s6 + $0xc28] sm:$0xff]  ;;  %v1066_v22 = vmul.f32 %v2093_v1, %v552_v19 }
  0xf9   : > { %1555 = vst [vmem:[%s2109_s21 + $0xb60] sm:$0xff] %v1043_v38  ;;  %1556 = vst [vmem:[%s2109_s21 + $0xb68] sm:$0xff] %v1044_v39  ;;  %v1067_v23 = vmul.f32 %v2093_v1, %v553_v20  ;;  %v1068_v24 = vmul.f32 %v2093_v1, %v554_v21  ;;  %v555_v25 = vld [vmem:[%s2086_s6 + $0xc30] sm:$0xff]  ;;  %v556_v26 = vld [vmem:[%s2086_s6 + $0xc38] sm:$0xff] }
  0xfa   : > { %1557 = vst [vmem:[%s2109_s21 + $0xb70] sm:$0xff] %v1045_v43  ;;  %1558 = vst [vmem:[%s2109_s21 + $0xb78] sm:$0xff] %v1046_v44  ;;  %v557_v27 = vld [vmem:[%s2086_s6 + $0xc40] sm:$0xff]  ;;  %v1069_v28 = vmul.f32 %v2093_v1, %v555_v25  ;;  %v1070_v29 = vmul.f32 %v2093_v1, %v556_v26  ;;  %v558_v31 = vld [vmem:[%s2086_s6 + $0xc48] sm:$0xff] }
  0xfb   : > { %1559 = vst [vmem:[%s2109_s21 + $0xb80] sm:$0xff] %v1047_v45  ;;  %1560 = vst [vmem:[%s2109_s21 + $0xb88] sm:$0xff] %v1048_v49  ;;  %v1071_v30 = vmul.f32 %v2093_v1, %v557_v27  ;;  %v559_v32 = vld [vmem:[%s2086_s6 + $0xc50] sm:$0xff]  ;;  %v560_v33 = vld [vmem:[%s2086_s6 + $0xc58] sm:$0xff]  ;;  %v1072_v34 = vmul.f32 %v2093_v1, %v558_v31 }
  0xfc   : > { %1561 = vst [vmem:[%s2109_s21 + $0xb90] sm:$0xff] %v1049_v50  ;;  %1562 = vst [vmem:[%s2109_s21 + $0xb98] sm:$0xff] %v1050_v51  ;;  %v1073_v35 = vmul.f32 %v2093_v1, %v559_v32  ;;  %v1074_v36 = vmul.f32 %v2093_v1, %v560_v33  ;;  %v561_v37 = vld [vmem:[%s2086_s6 + $0xc60] sm:$0xff]  ;;  %v562_v38 = vld [vmem:[%s2086_s6 + $0xc68] sm:$0xff] }
  0xfd   : > { %1563 = vst [vmem:[%s2109_s21 + $0xba0] sm:$0xff] %v1051_v55  ;;  %1564 = vst [vmem:[%s2109_s21 + $0xba8] sm:$0xff] %v1052_v56  ;;  %v563_v39 = vld [vmem:[%s2086_s6 + $0xc70] sm:$0xff]  ;;  %v1075_v40 = vmul.f32 %v2093_v1, %v561_v37  ;;  %v1076_v41 = vmul.f32 %v2093_v1, %v562_v38  ;;  %v564_v43 = vld [vmem:[%s2086_s6 + $0xc78] sm:$0xff] }
  0xfe   : > { %1565 = vst [vmem:[%s2109_s21 + $0xbb0] sm:$0xff] %v1053_v57  ;;  %1566 = vst [vmem:[%s2109_s21 + $0xbb8] sm:$0xff] %v1054_v61  ;;  %v1077_v42 = vmul.f32 %v2093_v1, %v563_v39  ;;  %v565_v44 = vld [vmem:[%s2086_s6 + $0xc80] sm:$0xff]  ;;  %v566_v45 = vld [vmem:[%s2086_s6 + $0xc88] sm:$0xff]  ;;  %v1078_v46 = vmul.f32 %v2093_v1, %v564_v43 }
  0xff   : > { %1567 = vst [vmem:[%s2109_s21 + $0xbc0] sm:$0xff] %v1055_v62  ;;  %1568 = vst [vmem:[%s2109_s21 + $0xbc8] sm:$0xff] %v1056_v63  ;;  %v1079_v47 = vmul.f32 %v2093_v1, %v565_v44  ;;  %v1080_v48 = vmul.f32 %v2093_v1, %v566_v45  ;;  %v567_v49 = vld [vmem:[%s2086_s6 + $0xc90] sm:$0xff]  ;;  %v568_v50 = vld [vmem:[%s2086_s6 + $0xc98] sm:$0xff] }
 0x100   : > { %1569 = vst [vmem:[%s2109_s21 + $0xbd0] sm:$0xff] %v1057_v4  ;;  %1570 = vst [vmem:[%s2109_s21 + $0xbd8] sm:$0xff] %v1058_v5  ;;  %v569_v51 = vld [vmem:[%s2086_s6 + $0xca0] sm:$0xff]  ;;  %v1081_v52 = vmul.f32 %v2093_v1, %v567_v49  ;;  %v1082_v53 = vmul.f32 %v2093_v1, %v568_v50  ;;  %v570_v55 = vld [vmem:[%s2086_s6 + $0xca8] sm:$0xff] }
 0x101   : > { %1571 = vst [vmem:[%s2109_s21 + $0xbe0] sm:$0xff] %v1059_v6  ;;  %1572 = vst [vmem:[%s2109_s21 + $0xbe8] sm:$0xff] %v1060_v10  ;;  %v1083_v54 = vmul.f32 %v2093_v1, %v569_v51  ;;  %v571_v56 = vld [vmem:[%s2086_s6 + $0xcb0] sm:$0xff]  ;;  %v572_v57 = vld [vmem:[%s2086_s6 + $0xcb8] sm:$0xff]  ;;  %v1084_v58 = vmul.f32 %v2093_v1, %v570_v55 }
 0x102   : > { %1573 = vst [vmem:[%s2109_s21 + $0xbf0] sm:$0xff] %v1061_v11  ;;  %1574 = vst [vmem:[%s2109_s21 + $0xbf8] sm:$0xff] %v1062_v12  ;;  %v1085_v59 = vmul.f32 %v2093_v1, %v571_v56  ;;  %v1086_v60 = vmul.f32 %v2093_v1, %v572_v57  ;;  %v573_v61 = vld [vmem:[%s2086_s6 + $0xcc0] sm:$0xff]  ;;  %v574_v62 = vld [vmem:[%s2086_s6 + $0xcc8] sm:$0xff] }
 0x103   : > { %1575 = vst [vmem:[%s2109_s21 + $0xc00] sm:$0xff] %v1063_v16  ;;  %1576 = vst [vmem:[%s2109_s21 + $0xc08] sm:$0xff] %v1064_v17  ;;  %v575_v63 = vld [vmem:[%s2086_s6 + $0xcd0] sm:$0xff]  ;;  %v1087_v0 = vmul.f32 %v2093_v1, %v573_v61  ;;  %v1088_v2 = vmul.f32 %v2093_v1, %v574_v62  ;;  %v576_v4 = vld [vmem:[%s2086_s6 + $0xcd8] sm:$0xff] }
 0x104   : > { %1577 = vst [vmem:[%s2109_s21 + $0xc10] sm:$0xff] %v1065_v18  ;;  %1578 = vst [vmem:[%s2109_s21 + $0xc18] sm:$0xff] %v1066_v22  ;;  %v1089_v3 = vmul.f32 %v2093_v1, %v575_v63  ;;  %v577_v5 = vld [vmem:[%s2086_s6 + $0xce0] sm:$0xff]  ;;  %v578_v6 = vld [vmem:[%s2086_s6 + $0xce8] sm:$0xff]  ;;  %v1090_v7 = vmul.f32 %v2093_v1, %v576_v4 }
 0x105   : > { %1579 = vst [vmem:[%s2109_s21 + $0xc20] sm:$0xff] %v1067_v23  ;;  %1580 = vst [vmem:[%s2109_s21 + $0xc28] sm:$0xff] %v1068_v24  ;;  %v1091_v8 = vmul.f32 %v2093_v1, %v577_v5  ;;  %v1092_v9 = vmul.f32 %v2093_v1, %v578_v6  ;;  %v579_v10 = vld [vmem:[%s2086_s6 + $0xcf0] sm:$0xff]  ;;  %v580_v11 = vld [vmem:[%s2086_s6 + $0xcf8] sm:$0xff] }
 0x106   : > { %1581 = vst [vmem:[%s2109_s21 + $0xc30] sm:$0xff] %v1069_v28  ;;  %1582 = vst [vmem:[%s2109_s21 + $0xc38] sm:$0xff] %v1070_v29  ;;  %v581_v12 = vld [vmem:[%s2086_s6 + $0xd00] sm:$0xff]  ;;  %v1093_v13 = vmul.f32 %v2093_v1, %v579_v10  ;;  %v1094_v14 = vmul.f32 %v2093_v1, %v580_v11  ;;  %v582_v16 = vld [vmem:[%s2086_s6 + $0xd08] sm:$0xff] }
 0x107   : > { %1583 = vst [vmem:[%s2109_s21 + $0xc40] sm:$0xff] %v1071_v30  ;;  %1584 = vst [vmem:[%s2109_s21 + $0xc48] sm:$0xff] %v1072_v34  ;;  %v1095_v15 = vmul.f32 %v2093_v1, %v581_v12  ;;  %v583_v17 = vld [vmem:[%s2086_s6 + $0xd10] sm:$0xff]  ;;  %v584_v18 = vld [vmem:[%s2086_s6 + $0xd18] sm:$0xff]  ;;  %v1096_v19 = vmul.f32 %v2093_v1, %v582_v16 }
 0x108   : > { %1585 = vst [vmem:[%s2109_s21 + $0xc50] sm:$0xff] %v1073_v35  ;;  %1586 = vst [vmem:[%s2109_s21 + $0xc58] sm:$0xff] %v1074_v36  ;;  %v1097_v20 = vmul.f32 %v2093_v1, %v583_v17  ;;  %v1098_v21 = vmul.f32 %v2093_v1, %v584_v18  ;;  %v585_v22 = vld [vmem:[%s2086_s6 + $0xd20] sm:$0xff]  ;;  %v586_v23 = vld [vmem:[%s2086_s6 + $0xd28] sm:$0xff] }
 0x109   : > { %1587 = vst [vmem:[%s2109_s21 + $0xc60] sm:$0xff] %v1075_v40  ;;  %1588 = vst [vmem:[%s2109_s21 + $0xc68] sm:$0xff] %v1076_v41  ;;  %v587_v24 = vld [vmem:[%s2086_s6 + $0xd30] sm:$0xff]  ;;  %v1099_v25 = vmul.f32 %v2093_v1, %v585_v22  ;;  %v1100_v26 = vmul.f32 %v2093_v1, %v586_v23  ;;  %v588_v28 = vld [vmem:[%s2086_s6 + $0xd38] sm:$0xff] }
 0x10a   : > { %1589 = vst [vmem:[%s2109_s21 + $0xc70] sm:$0xff] %v1077_v42  ;;  %1590 = vst [vmem:[%s2109_s21 + $0xc78] sm:$0xff] %v1078_v46  ;;  %v1101_v27 = vmul.f32 %v2093_v1, %v587_v24  ;;  %v589_v29 = vld [vmem:[%s2086_s6 + $0xd40] sm:$0xff]  ;;  %v590_v30 = vld [vmem:[%s2086_s6 + $0xd48] sm:$0xff]  ;;  %v1102_v31 = vmul.f32 %v2093_v1, %v588_v28 }
 0x10b   : > { %1591 = vst [vmem:[%s2109_s21 + $0xc80] sm:$0xff] %v1079_v47  ;;  %1592 = vst [vmem:[%s2109_s21 + $0xc88] sm:$0xff] %v1080_v48  ;;  %v1103_v32 = vmul.f32 %v2093_v1, %v589_v29  ;;  %v1104_v33 = vmul.f32 %v2093_v1, %v590_v30  ;;  %v591_v34 = vld [vmem:[%s2086_s6 + $0xd50] sm:$0xff]  ;;  %v592_v35 = vld [vmem:[%s2086_s6 + $0xd58] sm:$0xff] }
 0x10c   : > { %1593 = vst [vmem:[%s2109_s21 + $0xc90] sm:$0xff] %v1081_v52  ;;  %1594 = vst [vmem:[%s2109_s21 + $0xc98] sm:$0xff] %v1082_v53  ;;  %v593_v36 = vld [vmem:[%s2086_s6 + $0xd60] sm:$0xff]  ;;  %v1105_v37 = vmul.f32 %v2093_v1, %v591_v34  ;;  %v1106_v38 = vmul.f32 %v2093_v1, %v592_v35  ;;  %v594_v40 = vld [vmem:[%s2086_s6 + $0xd68] sm:$0xff] }
 0x10d   : > { %1595 = vst [vmem:[%s2109_s21 + $0xca0] sm:$0xff] %v1083_v54  ;;  %1596 = vst [vmem:[%s2109_s21 + $0xca8] sm:$0xff] %v1084_v58  ;;  %v1107_v39 = vmul.f32 %v2093_v1, %v593_v36  ;;  %v595_v41 = vld [vmem:[%s2086_s6 + $0xd70] sm:$0xff]  ;;  %v596_v42 = vld [vmem:[%s2086_s6 + $0xd78] sm:$0xff]  ;;  %v1108_v43 = vmul.f32 %v2093_v1, %v594_v40 }
 0x10e   : > { %1597 = vst [vmem:[%s2109_s21 + $0xcb0] sm:$0xff] %v1085_v59  ;;  %1598 = vst [vmem:[%s2109_s21 + $0xcb8] sm:$0xff] %v1086_v60  ;;  %v1109_v44 = vmul.f32 %v2093_v1, %v595_v41  ;;  %v1110_v45 = vmul.f32 %v2093_v1, %v596_v42  ;;  %v597_v46 = vld [vmem:[%s2086_s6 + $0xd80] sm:$0xff]  ;;  %v598_v47 = vld [vmem:[%s2086_s6 + $0xd88] sm:$0xff] }
 0x10f   : > { %1599 = vst [vmem:[%s2109_s21 + $0xcc0] sm:$0xff] %v1087_v0  ;;  %1600 = vst [vmem:[%s2109_s21 + $0xcc8] sm:$0xff] %v1088_v2  ;;  %v599_v48 = vld [vmem:[%s2086_s6 + $0xd90] sm:$0xff]  ;;  %v1111_v49 = vmul.f32 %v2093_v1, %v597_v46  ;;  %v1112_v50 = vmul.f32 %v2093_v1, %v598_v47  ;;  %v600_v52 = vld [vmem:[%s2086_s6 + $0xd98] sm:$0xff] }
 0x110   : > { %1601 = vst [vmem:[%s2109_s21 + $0xcd0] sm:$0xff] %v1089_v3  ;;  %1602 = vst [vmem:[%s2109_s21 + $0xcd8] sm:$0xff] %v1090_v7  ;;  %v1113_v51 = vmul.f32 %v2093_v1, %v599_v48  ;;  %v601_v53 = vld [vmem:[%s2086_s6 + $0xda0] sm:$0xff]  ;;  %v602_v54 = vld [vmem:[%s2086_s6 + $0xda8] sm:$0xff]  ;;  %v1114_v55 = vmul.f32 %v2093_v1, %v600_v52 }
 0x111   : > { %1603 = vst [vmem:[%s2109_s21 + $0xce0] sm:$0xff] %v1091_v8  ;;  %1604 = vst [vmem:[%s2109_s21 + $0xce8] sm:$0xff] %v1092_v9  ;;  %v1115_v56 = vmul.f32 %v2093_v1, %v601_v53  ;;  %v1116_v57 = vmul.f32 %v2093_v1, %v602_v54  ;;  %v603_v58 = vld [vmem:[%s2086_s6 + $0xdb0] sm:$0xff]  ;;  %v604_v59 = vld [vmem:[%s2086_s6 + $0xdb8] sm:$0xff] }
 0x112   : > { %1605 = vst [vmem:[%s2109_s21 + $0xcf0] sm:$0xff] %v1093_v13  ;;  %1606 = vst [vmem:[%s2109_s21 + $0xcf8] sm:$0xff] %v1094_v14  ;;  %v605_v60 = vld [vmem:[%s2086_s6 + $0xdc0] sm:$0xff]  ;;  %v1117_v61 = vmul.f32 %v2093_v1, %v603_v58  ;;  %v1118_v62 = vmul.f32 %v2093_v1, %v604_v59  ;;  %v606_v0 = vld [vmem:[%s2086_s6 + $0xdc8] sm:$0xff] }
 0x113   : > { %1607 = vst [vmem:[%s2109_s21 + $0xd00] sm:$0xff] %v1095_v15  ;;  %1608 = vst [vmem:[%s2109_s21 + $0xd08] sm:$0xff] %v1096_v19  ;;  %v1119_v63 = vmul.f32 %v2093_v1, %v605_v60  ;;  %v607_v2 = vld [vmem:[%s2086_s6 + $0xdd0] sm:$0xff]  ;;  %v608_v3 = vld [vmem:[%s2086_s6 + $0xdd8] sm:$0xff]  ;;  %v1120_v4 = vmul.f32 %v2093_v1, %v606_v0 }
 0x114   : > { %1609 = vst [vmem:[%s2109_s21 + $0xd10] sm:$0xff] %v1097_v20  ;;  %1610 = vst [vmem:[%s2109_s21 + $0xd18] sm:$0xff] %v1098_v21  ;;  %v1121_v5 = vmul.f32 %v2093_v1, %v607_v2  ;;  %v1122_v6 = vmul.f32 %v2093_v1, %v608_v3  ;;  %v609_v7 = vld [vmem:[%s2086_s6 + $0xde0] sm:$0xff]  ;;  %v610_v8 = vld [vmem:[%s2086_s6 + $0xde8] sm:$0xff] }
 0x115   : > { %1611 = vst [vmem:[%s2109_s21 + $0xd20] sm:$0xff] %v1099_v25  ;;  %1612 = vst [vmem:[%s2109_s21 + $0xd28] sm:$0xff] %v1100_v26  ;;  %v611_v9 = vld [vmem:[%s2086_s6 + $0xdf0] sm:$0xff]  ;;  %v1123_v10 = vmul.f32 %v2093_v1, %v609_v7  ;;  %v1124_v11 = vmul.f32 %v2093_v1, %v610_v8  ;;  %v612_v13 = vld [vmem:[%s2086_s6 + $0xdf8] sm:$0xff] }
 0x116   : > { %1613 = vst [vmem:[%s2109_s21 + $0xd30] sm:$0xff] %v1101_v27  ;;  %1614 = vst [vmem:[%s2109_s21 + $0xd38] sm:$0xff] %v1102_v31  ;;  %v1125_v12 = vmul.f32 %v2093_v1, %v611_v9  ;;  %v613_v14 = vld [vmem:[%s2086_s6 + $0xe00] sm:$0xff]  ;;  %v614_v15 = vld [vmem:[%s2086_s6 + $0xe08] sm:$0xff]  ;;  %v1126_v16 = vmul.f32 %v2093_v1, %v612_v13 }
 0x117   : > { %1615 = vst [vmem:[%s2109_s21 + $0xd40] sm:$0xff] %v1103_v32  ;;  %1616 = vst [vmem:[%s2109_s21 + $0xd48] sm:$0xff] %v1104_v33  ;;  %v1127_v17 = vmul.f32 %v2093_v1, %v613_v14  ;;  %v1128_v18 = vmul.f32 %v2093_v1, %v614_v15  ;;  %v615_v19 = vld [vmem:[%s2086_s6 + $0xe10] sm:$0xff]  ;;  %v616_v20 = vld [vmem:[%s2086_s6 + $0xe18] sm:$0xff] }
 0x118   : > { %1617 = vst [vmem:[%s2109_s21 + $0xd50] sm:$0xff] %v1105_v37  ;;  %1618 = vst [vmem:[%s2109_s21 + $0xd58] sm:$0xff] %v1106_v38  ;;  %v617_v21 = vld [vmem:[%s2086_s6 + $0xe20] sm:$0xff]  ;;  %v1129_v22 = vmul.f32 %v2093_v1, %v615_v19  ;;  %v1130_v23 = vmul.f32 %v2093_v1, %v616_v20  ;;  %v618_v25 = vld [vmem:[%s2086_s6 + $0xe28] sm:$0xff] }
 0x119   : > { %1619 = vst [vmem:[%s2109_s21 + $0xd60] sm:$0xff] %v1107_v39  ;;  %1620 = vst [vmem:[%s2109_s21 + $0xd68] sm:$0xff] %v1108_v43  ;;  %v1131_v24 = vmul.f32 %v2093_v1, %v617_v21  ;;  %v619_v26 = vld [vmem:[%s2086_s6 + $0xe30] sm:$0xff]  ;;  %v620_v27 = vld [vmem:[%s2086_s6 + $0xe38] sm:$0xff]  ;;  %v1132_v28 = vmul.f32 %v2093_v1, %v618_v25 }
 0x11a   : > { %1621 = vst [vmem:[%s2109_s21 + $0xd70] sm:$0xff] %v1109_v44  ;;  %1622 = vst [vmem:[%s2109_s21 + $0xd78] sm:$0xff] %v1110_v45  ;;  %v1133_v29 = vmul.f32 %v2093_v1, %v619_v26  ;;  %v1134_v30 = vmul.f32 %v2093_v1, %v620_v27  ;;  %v621_v31 = vld [vmem:[%s2086_s6 + $0xe40] sm:$0xff]  ;;  %v622_v32 = vld [vmem:[%s2086_s6 + $0xe48] sm:$0xff] }
 0x11b   : > { %1623 = vst [vmem:[%s2109_s21 + $0xd80] sm:$0xff] %v1111_v49  ;;  %1624 = vst [vmem:[%s2109_s21 + $0xd88] sm:$0xff] %v1112_v50  ;;  %v623_v33 = vld [vmem:[%s2086_s6 + $0xe50] sm:$0xff]  ;;  %v1135_v34 = vmul.f32 %v2093_v1, %v621_v31  ;;  %v1136_v35 = vmul.f32 %v2093_v1, %v622_v32  ;;  %v624_v37 = vld [vmem:[%s2086_s6 + $0xe58] sm:$0xff] }
 0x11c   : > { %1625 = vst [vmem:[%s2109_s21 + $0xd90] sm:$0xff] %v1113_v51  ;;  %1626 = vst [vmem:[%s2109_s21 + $0xd98] sm:$0xff] %v1114_v55  ;;  %v1137_v36 = vmul.f32 %v2093_v1, %v623_v33  ;;  %v625_v38 = vld [vmem:[%s2086_s6 + $0xe60] sm:$0xff]  ;;  %v626_v39 = vld [vmem:[%s2086_s6 + $0xe68] sm:$0xff]  ;;  %v1138_v40 = vmul.f32 %v2093_v1, %v624_v37 }
 0x11d   : > { %1627 = vst [vmem:[%s2109_s21 + $0xda0] sm:$0xff] %v1115_v56  ;;  %1628 = vst [vmem:[%s2109_s21 + $0xda8] sm:$0xff] %v1116_v57  ;;  %v1139_v41 = vmul.f32 %v2093_v1, %v625_v38  ;;  %v1140_v42 = vmul.f32 %v2093_v1, %v626_v39  ;;  %v627_v43 = vld [vmem:[%s2086_s6 + $0xe70] sm:$0xff]  ;;  %v628_v44 = vld [vmem:[%s2086_s6 + $0xe78] sm:$0xff] }
 0x11e   : > { %1629 = vst [vmem:[%s2109_s21 + $0xdb0] sm:$0xff] %v1117_v61  ;;  %1630 = vst [vmem:[%s2109_s21 + $0xdb8] sm:$0xff] %v1118_v62  ;;  %v629_v45 = vld [vmem:[%s2086_s6 + $0xe80] sm:$0xff]  ;;  %v1141_v46 = vmul.f32 %v2093_v1, %v627_v43  ;;  %v1142_v47 = vmul.f32 %v2093_v1, %v628_v44  ;;  %v630_v49 = vld [vmem:[%s2086_s6 + $0xe88] sm:$0xff] }
 0x11f   : > { %1631 = vst [vmem:[%s2109_s21 + $0xdc0] sm:$0xff] %v1119_v63  ;;  %1632 = vst [vmem:[%s2109_s21 + $0xdc8] sm:$0xff] %v1120_v4  ;;  %v1143_v48 = vmul.f32 %v2093_v1, %v629_v45  ;;  %v631_v50 = vld [vmem:[%s2086_s6 + $0xe90] sm:$0xff]  ;;  %v632_v51 = vld [vmem:[%s2086_s6 + $0xe98] sm:$0xff]  ;;  %v1144_v52 = vmul.f32 %v2093_v1, %v630_v49 }
 0x120   : > { %1633 = vst [vmem:[%s2109_s21 + $0xdd0] sm:$0xff] %v1121_v5  ;;  %1634 = vst [vmem:[%s2109_s21 + $0xdd8] sm:$0xff] %v1122_v6  ;;  %v1145_v53 = vmul.f32 %v2093_v1, %v631_v50  ;;  %v1146_v54 = vmul.f32 %v2093_v1, %v632_v51  ;;  %v633_v55 = vld [vmem:[%s2086_s6 + $0xea0] sm:$0xff]  ;;  %v634_v56 = vld [vmem:[%s2086_s6 + $0xea8] sm:$0xff] }
 0x121   : > { %1635 = vst [vmem:[%s2109_s21 + $0xde0] sm:$0xff] %v1123_v10  ;;  %1636 = vst [vmem:[%s2109_s21 + $0xde8] sm:$0xff] %v1124_v11  ;;  %v635_v57 = vld [vmem:[%s2086_s6 + $0xeb0] sm:$0xff]  ;;  %v1147_v58 = vmul.f32 %v2093_v1, %v633_v55  ;;  %v1148_v59 = vmul.f32 %v2093_v1, %v634_v56  ;;  %v636_v61 = vld [vmem:[%s2086_s6 + $0xeb8] sm:$0xff] }
 0x122   : > { %1637 = vst [vmem:[%s2109_s21 + $0xdf0] sm:$0xff] %v1125_v12  ;;  %1638 = vst [vmem:[%s2109_s21 + $0xdf8] sm:$0xff] %v1126_v16  ;;  %v1149_v60 = vmul.f32 %v2093_v1, %v635_v57  ;;  %v637_v62 = vld [vmem:[%s2086_s6 + $0xec0] sm:$0xff]  ;;  %v638_v63 = vld [vmem:[%s2086_s6 + $0xec8] sm:$0xff]  ;;  %v1150_v0 = vmul.f32 %v2093_v1, %v636_v61 }
 0x123   : > { %1639 = vst [vmem:[%s2109_s21 + $0xe00] sm:$0xff] %v1127_v17  ;;  %1640 = vst [vmem:[%s2109_s21 + $0xe08] sm:$0xff] %v1128_v18  ;;  %v1151_v2 = vmul.f32 %v2093_v1, %v637_v62  ;;  %v1152_v3 = vmul.f32 %v2093_v1, %v638_v63  ;;  %v639_v4 = vld [vmem:[%s2086_s6 + $0xed0] sm:$0xff]  ;;  %v640_v5 = vld [vmem:[%s2086_s6 + $0xed8] sm:$0xff] }
 0x124   : > { %1641 = vst [vmem:[%s2109_s21 + $0xe10] sm:$0xff] %v1129_v22  ;;  %1642 = vst [vmem:[%s2109_s21 + $0xe18] sm:$0xff] %v1130_v23  ;;  %v641_v6 = vld [vmem:[%s2086_s6 + $0xee0] sm:$0xff]  ;;  %v1153_v7 = vmul.f32 %v2093_v1, %v639_v4  ;;  %v1154_v8 = vmul.f32 %v2093_v1, %v640_v5  ;;  %v642_v10 = vld [vmem:[%s2086_s6 + $0xee8] sm:$0xff] }
 0x125   : > { %1643 = vst [vmem:[%s2109_s21 + $0xe20] sm:$0xff] %v1131_v24  ;;  %1644 = vst [vmem:[%s2109_s21 + $0xe28] sm:$0xff] %v1132_v28  ;;  %v1155_v9 = vmul.f32 %v2093_v1, %v641_v6  ;;  %v643_v11 = vld [vmem:[%s2086_s6 + $0xef0] sm:$0xff]  ;;  %v644_v12 = vld [vmem:[%s2086_s6 + $0xef8] sm:$0xff]  ;;  %v1156_v13 = vmul.f32 %v2093_v1, %v642_v10 }
 0x126   : > { %1645 = vst [vmem:[%s2109_s21 + $0xe30] sm:$0xff] %v1133_v29  ;;  %1646 = vst [vmem:[%s2109_s21 + $0xe38] sm:$0xff] %v1134_v30  ;;  %v1157_v14 = vmul.f32 %v2093_v1, %v643_v11  ;;  %v1158_v15 = vmul.f32 %v2093_v1, %v644_v12  ;;  %v645_v16 = vld [vmem:[%s2086_s6 + $0xf00] sm:$0xff]  ;;  %v646_v17 = vld [vmem:[%s2086_s6 + $0xf08] sm:$0xff] }
 0x127   : > { %1647 = vst [vmem:[%s2109_s21 + $0xe40] sm:$0xff] %v1135_v34  ;;  %1648 = vst [vmem:[%s2109_s21 + $0xe48] sm:$0xff] %v1136_v35  ;;  %v647_v18 = vld [vmem:[%s2086_s6 + $0xf10] sm:$0xff]  ;;  %v1159_v19 = vmul.f32 %v2093_v1, %v645_v16  ;;  %v1160_v20 = vmul.f32 %v2093_v1, %v646_v17  ;;  %v648_v22 = vld [vmem:[%s2086_s6 + $0xf18] sm:$0xff] }
 0x128   : > { %1649 = vst [vmem:[%s2109_s21 + $0xe50] sm:$0xff] %v1137_v36  ;;  %1650 = vst [vmem:[%s2109_s21 + $0xe58] sm:$0xff] %v1138_v40  ;;  %v1161_v21 = vmul.f32 %v2093_v1, %v647_v18  ;;  %v649_v23 = vld [vmem:[%s2086_s6 + $0xf20] sm:$0xff]  ;;  %v650_v24 = vld [vmem:[%s2086_s6 + $0xf28] sm:$0xff]  ;;  %v1162_v25 = vmul.f32 %v2093_v1, %v648_v22 }
 0x129   : > { %1651 = vst [vmem:[%s2109_s21 + $0xe60] sm:$0xff] %v1139_v41  ;;  %1652 = vst [vmem:[%s2109_s21 + $0xe68] sm:$0xff] %v1140_v42  ;;  %v1163_v26 = vmul.f32 %v2093_v1, %v649_v23  ;;  %v1164_v27 = vmul.f32 %v2093_v1, %v650_v24  ;;  %v651_v28 = vld [vmem:[%s2086_s6 + $0xf30] sm:$0xff]  ;;  %v652_v29 = vld [vmem:[%s2086_s6 + $0xf38] sm:$0xff] }
 0x12a   : > { %1653 = vst [vmem:[%s2109_s21 + $0xe70] sm:$0xff] %v1141_v46  ;;  %1654 = vst [vmem:[%s2109_s21 + $0xe78] sm:$0xff] %v1142_v47  ;;  %v653_v30 = vld [vmem:[%s2086_s6 + $0xf40] sm:$0xff]  ;;  %v1165_v31 = vmul.f32 %v2093_v1, %v651_v28  ;;  %v1166_v32 = vmul.f32 %v2093_v1, %v652_v29  ;;  %v654_v34 = vld [vmem:[%s2086_s6 + $0xf48] sm:$0xff] }
 0x12b   : > { %1655 = vst [vmem:[%s2109_s21 + $0xe80] sm:$0xff] %v1143_v48  ;;  %1656 = vst [vmem:[%s2109_s21 + $0xe88] sm:$0xff] %v1144_v52  ;;  %v1167_v33 = vmul.f32 %v2093_v1, %v653_v30  ;;  %v655_v35 = vld [vmem:[%s2086_s6 + $0xf50] sm:$0xff]  ;;  %v656_v36 = vld [vmem:[%s2086_s6 + $0xf58] sm:$0xff]  ;;  %v1168_v37 = vmul.f32 %v2093_v1, %v654_v34 }
 0x12c   : > { %1657 = vst [vmem:[%s2109_s21 + $0xe90] sm:$0xff] %v1145_v53  ;;  %1658 = vst [vmem:[%s2109_s21 + $0xe98] sm:$0xff] %v1146_v54  ;;  %v1169_v38 = vmul.f32 %v2093_v1, %v655_v35  ;;  %v1170_v39 = vmul.f32 %v2093_v1, %v656_v36  ;;  %v657_v40 = vld [vmem:[%s2086_s6 + $0xf60] sm:$0xff]  ;;  %v658_v41 = vld [vmem:[%s2086_s6 + $0xf68] sm:$0xff] }
 0x12d   : > { %1659 = vst [vmem:[%s2109_s21 + $0xea0] sm:$0xff] %v1147_v58  ;;  %1660 = vst [vmem:[%s2109_s21 + $0xea8] sm:$0xff] %v1148_v59  ;;  %v659_v42 = vld [vmem:[%s2086_s6 + $0xf70] sm:$0xff]  ;;  %v1171_v43 = vmul.f32 %v2093_v1, %v657_v40  ;;  %v1172_v44 = vmul.f32 %v2093_v1, %v658_v41  ;;  %v660_v46 = vld [vmem:[%s2086_s6 + $0xf78] sm:$0xff] }
 0x12e   : > { %1661 = vst [vmem:[%s2109_s21 + $0xeb0] sm:$0xff] %v1149_v60  ;;  %1662 = vst [vmem:[%s2109_s21 + $0xeb8] sm:$0xff] %v1150_v0  ;;  %v1173_v45 = vmul.f32 %v2093_v1, %v659_v42  ;;  %v661_v47 = vld [vmem:[%s2086_s6 + $0xf80] sm:$0xff]  ;;  %v662_v48 = vld [vmem:[%s2086_s6 + $0xf88] sm:$0xff]  ;;  %v1174_v49 = vmul.f32 %v2093_v1, %v660_v46 }
 0x12f   : > { %1663 = vst [vmem:[%s2109_s21 + $0xec0] sm:$0xff] %v1151_v2  ;;  %1664 = vst [vmem:[%s2109_s21 + $0xec8] sm:$0xff] %v1152_v3  ;;  %v1175_v50 = vmul.f32 %v2093_v1, %v661_v47  ;;  %v1176_v51 = vmul.f32 %v2093_v1, %v662_v48  ;;  %v663_v52 = vld [vmem:[%s2086_s6 + $0xf90] sm:$0xff]  ;;  %v664_v53 = vld [vmem:[%s2086_s6 + $0xf98] sm:$0xff] }
 0x130   : > { %1665 = vst [vmem:[%s2109_s21 + $0xed0] sm:$0xff] %v1153_v7  ;;  %1666 = vst [vmem:[%s2109_s21 + $0xed8] sm:$0xff] %v1154_v8  ;;  %v665_v54 = vld [vmem:[%s2086_s6 + $0xfa0] sm:$0xff]  ;;  %v1177_v55 = vmul.f32 %v2093_v1, %v663_v52  ;;  %v1178_v56 = vmul.f32 %v2093_v1, %v664_v53  ;;  %v666_v58 = vld [vmem:[%s2086_s6 + $0xfa8] sm:$0xff] }
 0x131   : > { %1667 = vst [vmem:[%s2109_s21 + $0xee0] sm:$0xff] %v1155_v9  ;;  %1668 = vst [vmem:[%s2109_s21 + $0xee8] sm:$0xff] %v1156_v13  ;;  %v1179_v57 = vmul.f32 %v2093_v1, %v665_v54  ;;  %v667_v59 = vld [vmem:[%s2086_s6 + $0xfb0] sm:$0xff]  ;;  %v668_v60 = vld [vmem:[%s2086_s6 + $0xfb8] sm:$0xff]  ;;  %v1180_v61 = vmul.f32 %v2093_v1, %v666_v58 }
 0x132   : > { %1669 = vst [vmem:[%s2109_s21 + $0xef0] sm:$0xff] %v1157_v14  ;;  %1670 = vst [vmem:[%s2109_s21 + $0xef8] sm:$0xff] %v1158_v15  ;;  %v1181_v62 = vmul.f32 %v2093_v1, %v667_v59  ;;  %v1182_v63 = vmul.f32 %v2093_v1, %v668_v60  ;;  %v669_v0 = vld [vmem:[%s2086_s6 + $0xfc0] sm:$0xff]  ;;  %v670_v2 = vld [vmem:[%s2086_s6 + $0xfc8] sm:$0xff] }
 0x133   : > { %1671 = vst [vmem:[%s2109_s21 + $0xf00] sm:$0xff] %v1159_v19  ;;  %1672 = vst [vmem:[%s2109_s21 + $0xf08] sm:$0xff] %v1160_v20  ;;  %v671_v3 = vld [vmem:[%s2086_s6 + $0xfd0] sm:$0xff]  ;;  %v1183_v4 = vmul.f32 %v2093_v1, %v669_v0  ;;  %v1184_v5 = vmul.f32 %v2093_v1, %v670_v2  ;;  %v672_v7 = vld [vmem:[%s2086_s6 + $0xfd8] sm:$0xff] }
 0x134   : > { %1673 = vst [vmem:[%s2109_s21 + $0xf10] sm:$0xff] %v1161_v21  ;;  %1674 = vst [vmem:[%s2109_s21 + $0xf18] sm:$0xff] %v1162_v25  ;;  %v1185_v6 = vmul.f32 %v2093_v1, %v671_v3  ;;  %v673_v8 = vld [vmem:[%s2086_s6 + $0xfe0] sm:$0xff]  ;;  %v674_v9 = vld [vmem:[%s2086_s6 + $0xfe8] sm:$0xff]  ;;  %v1186_v10 = vmul.f32 %v2093_v1, %v672_v7 }
 0x135   : > { %1675 = vst [vmem:[%s2109_s21 + $0xf20] sm:$0xff] %v1163_v26  ;;  %1676 = vst [vmem:[%s2109_s21 + $0xf28] sm:$0xff] %v1164_v27  ;;  %v1187_v11 = vmul.f32 %v2093_v1, %v673_v8  ;;  %v1188_v12 = vmul.f32 %v2093_v1, %v674_v9  ;;  %v675_v13 = vld [vmem:[%s2086_s6 + $0xff0] sm:$0xff]  ;;  %v676_v14 = vld [vmem:[%s2086_s6 + $0xff8] sm:$0xff] }
 0x136   : > { %1677 = vst [vmem:[%s2109_s21 + $0xf30] sm:$0xff] %v1165_v31  ;;  %1678 = vst [vmem:[%s2109_s21 + $0xf38] sm:$0xff] %v1166_v32  ;;  %v1189_v15 = vmul.f32 %v2093_v1, %v675_v13  ;;  %v1190_v16 = vmul.f32 %v2093_v1, %v676_v14 }
 0x137   : > { %1679 = vst [vmem:[%s2109_s21 + $0xf40] sm:$0xff] %v1167_v33  ;;  %1680 = vst [vmem:[%s2109_s21 + $0xf48] sm:$0xff] %v1168_v37 }
 0x138   : > { %1681 = vst [vmem:[%s2109_s21 + $0xf50] sm:$0xff] %v1169_v38  ;;  %1682 = vst [vmem:[%s2109_s21 + $0xf58] sm:$0xff] %v1170_v39 }
 0x139   : > { %1683 = vst [vmem:[%s2109_s21 + $0xf60] sm:$0xff] %v1171_v43  ;;  %1684 = vst [vmem:[%s2109_s21 + $0xf68] sm:$0xff] %v1172_v44 }
 0x13a   : > { %1685 = vst [vmem:[%s2109_s21 + $0xf70] sm:$0xff] %v1173_v45  ;;  %1686 = vst [vmem:[%s2109_s21 + $0xf78] sm:$0xff] %v1174_v49 }
 0x13b   : > { %1687 = vst [vmem:[%s2109_s21 + $0xf80] sm:$0xff] %v1175_v50  ;;  %1688 = vst [vmem:[%s2109_s21 + $0xf88] sm:$0xff] %v1176_v51 }
 0x13c   : > { %1689 = vst [vmem:[%s2109_s21 + $0xf90] sm:$0xff] %v1177_v55  ;;  %1690 = vst [vmem:[%s2109_s21 + $0xf98] sm:$0xff] %v1178_v56 }
 0x13d   : > { %1691 = vst [vmem:[%s2109_s21 + $0xfa0] sm:$0xff] %v1179_v57  ;;  %1692 = vst [vmem:[%s2109_s21 + $0xfa8] sm:$0xff] %v1180_v61 }
 0x13e   : > { %1693 = vst [vmem:[%s2109_s21 + $0xfb0] sm:$0xff] %v1181_v62  ;;  %1694 = vst [vmem:[%s2109_s21 + $0xfb8] sm:$0xff] %v1182_v63 }
 0x13f   : > { %1695 = vst [vmem:[%s2109_s21 + $0xfc0] sm:$0xff] %v1183_v4  ;;  %1696 = vst [vmem:[%s2109_s21 + $0xfc8] sm:$0xff] %v1184_v5 }
 0x140   : > { %1697 = vst [vmem:[%s2109_s21 + $0xfd0] sm:$0xff] %v1185_v6  ;;  %1698 = vst [vmem:[%s2109_s21 + $0xfd8] sm:$0xff] %v1186_v10 }
 0x141   : > { %1699 = vst [vmem:[%s2109_s21 + $0xfe0] sm:$0xff] %v1187_v11  ;;  %1700 = vst [vmem:[%s2109_s21 + $0xfe8] sm:$0xff] %v1188_v12 }
 0x142   : > { %1701 = vst [vmem:[%s2109_s21 + $0xff0] sm:$0xff] %v1189_v15  ;;  %1702 = vst [vmem:[%s2109_s21 + $0xff8] sm:$0xff] %v1190_v16 }
 0x143   : > { %1899 = shalt.err (!%p1896_p2)
}
 0x144   : > { %s1900_s18 = scalar_lea.hbm %s3627_s7, 65536  ;;  %s1904_s25 = scalar_lea.hbm %s3685_s2, 131072 }
 0x145   : > { %p1901_p4 = scmp.ne.s32.totalorder %s3627_s7, %s1900_s18  ;;  %p1905_p9 = scmp.lt.u32.totalorder %s3627_s7, %s3685_s2 }
 0x146   : > { %p1906_p1 = scmp.lt.u32.totalorder %s1904_s25, %s1900_s18  ;;  %p1908_p6 = scmp.lt.u32.totalorder %s1900_s18, %s3627_s7 }
 0x147   : > { %p1902_p5 = pnand %p1901_p4, %p3692_p11 }
 0x148   : > { %p1907_p3 = por %p1906_p1, %p1905_p9 }
 0x149   : > { %p1903_p7 = pneg %p1902_p5 }
 0x14a   : > { %p1909_p12 = por %p1908_p6, %p1907_p3 }
 0x14c   : > { %p1910_p13 = pnand %p1909_p12, %p1903_p7 }
 0x14e   : > { %1913 = shalt.err (!%p1910_p13)
}
 0x14f   : > { %s1958_s30 = smov 128   ;;  %s1959_s6 = smov 8  }
 0x150   : > { %1808 = dma.vmem_to_hbm [thread:$0]  (%p3692_p11), %s3629_s4, 65536, %s3627_s7, %s1704_s8, %s1958_s30, %s1958_s30, %s1959_s6  }
 0x151 PF: > { %s1732_s29 = sand.u32 1, %s1940_s11   ;;  %p3693_p8 = scmp.ne.s32.totalorder %s3690_s23, 0 }
 0x152   : > { %p3694_p10 = scmp.ge.s32.totalorder %s1952_s14, 2  ;;  %s1733_s21 = scalar_lea.sflag [#allocation5], %s1732_s29 }
 0x154   : > { %p1815_p0 = pnand %p3694_p10, %p3693_p8 }
 0x156   : > { %1935 = dma.done.wait (!%p1815_p0), %s1733_s21, 65536  }
 0x157   : > { %1937 = vsyncadd (!%p1815_p0), %s1733_s21, 4294901760  ;;  %p16_p2 = scmp.ge.s32.totalorder %s2003_s16, 4   ;;  %s3695_s11 = smov %s1944_s12 }
 0x158   : > { %s3696_s12 = smov %s1948_s13  ;;  %s3697_s13 = smov %s2015_s19 }
 0x159   : > { %s3698_s14 = smov %s2003_s16  ;;  %18 = sbr.rel (!%p16_p2) target bundleno = 7 (0x7), region = 73 }
 0x160   :  { %1738 = vsyncpa [#allocation4], 1 }
 0x161   :  { %1740 = vsyncpa [#allocation4 + $0x1], 1 }
 0x162   :  { %1741 = vsyncpa [#allocation5], 1 }
 0x163   :  { %1743 = vsyncpa [#allocation5 + $0x1], 1 }

</bundles_post_ra>
